<compile_context>
chip_gen: v6e
topology: v6e:2x2x1
jax: 0.10.0
libtpu: 0.0.40
codegen_flags: <defaults>
</compile_context>

<pallas_src>
import jax
import jax.numpy as jnp
from jax.experimental import pallas as pl
from jax.experimental.pallas import tpu as pltpu

EPS = 1e-5
D1, D2 = 64, 32


def bn_mlp_kernel(x_ref, w1_ref, bn1_ref, w2_ref, bn2_ref, o_ref, h1_acc):
    k = pl.program_id(0)

    @pl.when(k == 0)
    def _init():
        h1_acc[...] = jnp.zeros_like(h1_acc)

    # K-tiled first matmul accumulation.  No "+ bias": dead under training BN.
    h1_acc[...] += jnp.dot(x_ref[...], w1_ref[...],
                           preferred_element_type=jnp.float32)

    @pl.when(k == pl.num_programs(0) - 1)
    def _epilogue():
        # ---- BatchNorm1d(64, training) + ReLU ----
        h1 = h1_acc[...]                                              # (B, 64)
        mu1 = jnp.mean(h1, axis=0, keepdims=True)
        var1 = jnp.mean((h1 - mu1) * (h1 - mu1), axis=0, keepdims=True)
        h1 = (h1 - mu1) * jax.lax.rsqrt(var1 + EPS)
        h1 = h1 * bn1_ref[0:1, :] + bn1_ref[1:2, :]                   # gamma, beta
        h1 = jnp.maximum(h1, 0.0)

        # ---- linear2 (bias dead under BN) + BatchNorm1d(32, training) + ReLU ----
        h2 = jnp.dot(h1, w2_ref[...], preferred_element_type=jnp.float32)
        mu2 = jnp.mean(h2, axis=0, keepdims=True)
        var2 = jnp.mean((h2 - mu2) * (h2 - mu2), axis=0, keepdims=True)
        h2 = (h2 - mu2) * jax.lax.rsqrt(var2 + EPS)
        h2 = h2 * bn2_ref[0:1, :] + bn2_ref[1:2, :]
        h2 = jnp.maximum(h2, 0.0)

        o_ref[...] = h2.astype(o_ref.dtype)                           # (B, 32)


def _pick_tk(B, D_in):
    """Reduction tile.  Single step when the whole x + W1 slab is small
    (avoids per-grid-step overhead at toy sizes); otherwise tk<=256 so two
    buffers of (B,tk)+(tk,64) f32 stay well under v7x's 64 MiB VMEM."""
    full_bytes = 4 * (B * D_in + D_in * D1)
    if full_bytes <= (4 << 20):
        return D_in
    for tk in (256, 128):
        if D_in % tk == 0:
            return tk
    return D_in


def bn_test_forward(x_nchw, params):
    """x_nchw: (B, 3, 32, 32) float32 -> (B, 32) float32."""
    w1, _b1, bn1, w2, _b2, bn2 = params        # linear biases intentionally unused
    B = x_nchw.shape[0]
    x_flat = x_nchw.reshape(B, -1)             # nn.Flatten on NCHW
    D_in = x_flat.shape[1]

    tk = _pick_tk(B, D_in)
    nk = D_in // tk

    # VMEM request: double-buffered x/W1 tiles + accumulator + small params,
    # floored for compiler scratch headroom, capped below v7x's 64 MiB.
    vmem_need = (2 * 4 * (B * tk + tk * D1)          # pipelined input tiles
                 + 4 * B * D1                        # accumulator scratch
                 + 4 * (D1 * D2 + 2 * D1 + 2 * D2)   # params
                 + 2 * 4 * B * D2                    # output
                 + (1 << 20))
    vmem_limit = int(min(48 << 20, max(16 << 20, vmem_need)))

    cost = pl.CostEstimate(
        flops=2 * B * D_in * D1 + 2 * B * D1 * D2,
        transcendentals=D1 + D2,
        bytes_accessed=4 * (B * D_in + D_in * D1 + D1 * D2
                            + 2 * D1 + 2 * D2 + B * D2),
    )

    grid_spec = pltpu.PrefetchScalarGridSpec(
        num_scalar_prefetch=0,
        grid=(nk,),
        in_specs=[
            pl.BlockSpec((B, tk), lambda k: (0, k)),      # x tile
            pl.BlockSpec((tk, D1), lambda k: (k, 0)),     # W1 tile
            pl.BlockSpec((2, D1), lambda k: (0, 0)),      # [gamma1; beta1]
            pl.BlockSpec((D1, D2), lambda k: (0, 0)),     # W2
            pl.BlockSpec((2, D2), lambda k: (0, 0)),      # [gamma2; beta2]
        ],
        out_specs=pl.BlockSpec((B, D2), lambda k: (0, 0)),
        scratch_shapes=[pltpu.VMEM((B, D1), jnp.float32)],
    )

    return pl.pallas_call(
        bn_mlp_kernel,
        out_shape=jax.ShapeDtypeStruct((B, D2), jnp.float32),
        grid_spec=grid_spec,
        compiler_params=pltpu.CompilerParams(
            dimension_semantics=("arbitrary",),           # K is a reduction axis
            vmem_limit_bytes=vmem_limit),
        cost_estimate=cost,
    )(x_flat, w1, bn1, w2, bn2)


def init_params(key):
    """PyTorch-style init: Linear weights/biases uniform(-1/sqrt(fan_in), ..),
    fresh BatchNorm1d gamma=1, beta=0.  Weights stored transposed (in, out).
    BN params stacked as (gamma; beta) -> one small slab per layer."""
    k1, k2, k3, k4 = jax.random.split(key, 4)
    d_in = 32 * 32 * 3

    bound1 = 1.0 / jnp.sqrt(d_in)
    w1 = jax.random.uniform(k1, (d_in, D1), jnp.float32, -bound1, bound1)
    b1 = jax.random.uniform(k2, (1, D1), jnp.float32, -bound1, bound1)

    bound2 = 1.0 / jnp.sqrt(D1)
    w2 = jax.random.uniform(k3, (D1, D2), jnp.float32, -bound2, bound2)
    b2 = jax.random.uniform(k4, (1, D2), jnp.float32, -bound2, bound2)

    bn1 = jnp.concatenate([jnp.ones((1, D1)), jnp.zeros((1, D1))], 0).astype(jnp.float32)
    bn2 = jnp.concatenate([jnp.ones((1, D2)), jnp.zeros((1, D2))], 0).astype(jnp.float32)
    return (w1, b1, bn1, w2, b2, bn2)


def reference_forward(x_nchw, params):
    """Pure-JAX reference with the FULL PyTorch math (including Linear biases),
    verifying that dropping bias under training-mode BN is a no-op."""
    w1, b1, bn1, w2, b2, bn2 = params
    x = x_nchw.reshape(x_nchw.shape[0], -1)
    h = x @ w1 + b1
    h = (h - h.mean(0, keepdims=True)) / jnp.sqrt(h.var(0, keepdims=True) + EPS)
    h = jnp.maximum(h * bn1[0:1] + bn1[1:2], 0.0)
    h = h @ w2 + b2
    h = (h - h.mean(0, keepdims=True)) / jnp.sqrt(h.var(0, keepdims=True) + EPS)
    h = jnp.maximum(h * bn2[0:1] + bn2[1:2], 0.0)
    return h


if __name__ == "__main__":
    key = jax.random.PRNGKey(0)
    kx, kp = jax.random.split(key)

    B = 8  # keep batch a multiple of 8 (f32 sublane tiling; BN stats span the batch)
    x = jax.random.normal(kx, (B, 3, 32, 32), jnp.float32)   # NCHW input
    params = init_params(kp)

    out = jax.block_until_ready(bn_test_forward(x, params))
    ref = reference_forward(x, params)

    assert out.shape == (B, 32)
    assert jnp.allclose(out, ref, atol=1e-4, rtol=1e-4), "mismatch vs reference"

    print("KERNEL_OK")
</pallas_src>

<mosaic_0001>
module attributes {stable_mosaic.version = 11 : i64} {
  func.func @bn_mlp_kernel(%arg0: i32, %arg1: memref<8x3072xf32, #tpu.memory_space<vmem>>, %arg2: memref<3072x64xf32, #tpu.memory_space<vmem>>, %arg3: memref<2x64xf32, #tpu.memory_space<vmem>>, %arg4: memref<64x32xf32, #tpu.memory_space<vmem>>, %arg5: memref<2x32xf32, #tpu.memory_space<vmem>>, %arg6: memref<8x32xf32, #tpu.memory_space<vmem>>, %arg7: memref<8x64xf32, #tpu.memory_space<vmem>>) attributes {dimension_semantics = [#tpu.dimension_semantics<arbitrary>], iteration_bounds = array<i64: 1>, scalar_prefetch = 0 : i64, scratch_operands = 1 : i64, tpu.core_type = #tpu.core_type<tc>, window_params = [{transform_indices = @transform_0, window_bounds = array<i64: 8, 3072>}, {transform_indices = @transform_1, window_bounds = array<i64: 3072, 64>}, {pipeline_mode = #tpu.pipeline_mode<synchronous>, transform_indices = @transform_2, window_bounds = array<i64: 2, 64>}, {pipeline_mode = #tpu.pipeline_mode<synchronous>, transform_indices = @transform_3, window_bounds = array<i64: 64, 32>}, {pipeline_mode = #tpu.pipeline_mode<synchronous>, transform_indices = @transform_4, window_bounds = array<i64: 2, 32>}, {pipeline_mode = #tpu.pipeline_mode<synchronous>, transform_indices = @transform_5, window_bounds = array<i64: 8, 32>}]} {
    %c0_i32 = arith.constant 0 : i32
    %0 = arith.cmpi eq, %arg0, %c0_i32 : i32
    %1 = arith.extui %0 : i1 to i32
    %c0_i32_0 = arith.constant 0 : i32
    %2 = arith.cmpi ne, %1, %c0_i32_0 : i32
    scf.if %2 {
      %cst_10 = arith.constant 0.000000e+00 : f32
      %12 = vector.broadcast %cst_10 : f32 to vector<8x64xf32>
      %c0_11 = arith.constant 0 : index
      %c0_12 = arith.constant 0 : index
      %13 = vector.load %arg7[%c0_11, %c0_12] : memref<8x64xf32, #tpu.memory_space<vmem>>, vector<8x64xf32>
      tpu.vector_store %arg7[%c0_11, %c0_12], %12 {strides = array<i32>} : memref<8x64xf32, #tpu.memory_space<vmem>>, vector<8x64xf32>,
    } else {
    }
    %c0 = arith.constant 0 : index
    %c0_1 = arith.constant 0 : index
    %3 = vector.load %arg7[%c0, %c0_1] : memref<8x64xf32, #tpu.memory_space<vmem>>, vector<8x64xf32>
    %c0_2 = arith.constant 0 : index
    %c0_3 = arith.constant 0 : index
    %4 = vector.load %arg1[%c0_2, %c0_3] : memref<8x3072xf32, #tpu.memory_space<vmem>>, vector<8x3072xf32>
    %c0_4 = arith.constant 0 : index
    %c0_5 = arith.constant 0 : index
    %5 = vector.load %arg2[%c0_4, %c0_5] : memref<3072x64xf32, #tpu.memory_space<vmem>>, vector<3072x64xf32>
    %cst = arith.constant dense<0.000000e+00> : vector<8x64xf32>
    %6 = tpu.matmul %4, %5, %cst {dimension_numbers = #tpu.dot_dimension_numbers<[1], [0], [0], [1], [0, 0, 1, 1], [], []>} : vector<8x3072xf32>, vector<3072x64xf32>, vector<8x64xf32> -> vector<8x64xf32>
    %7 = arith.addf %3, %6 : vector<8x64xf32>
    %c0_6 = arith.constant 0 : index
    %c0_7 = arith.constant 0 : index
    %8 = vector.load %arg7[%c0_6, %c0_7] : memref<8x64xf32, #tpu.memory_space<vmem>>, vector<8x64xf32>
    tpu.vector_store %arg7[%c0_6, %c0_7], %7 {strides = array<i32>} : memref<8x64xf32, #tpu.memory_space<vmem>>, vector<8x64xf32>,
    %c0_i32_8 = arith.constant 0 : i32
    %9 = arith.cmpi eq, %arg0, %c0_i32_8 : i32
    %10 = arith.extui %9 : i1 to i32
    %c0_i32_9 = arith.constant 0 : i32
    %11 = arith.cmpi ne, %10, %c0_i32_9 : i32
    scf.if %11 {
      %c0_10 = arith.constant 0 : index
      %c0_11 = arith.constant 0 : index
      %12 = vector.load %arg7[%c0_10, %c0_11] : memref<8x64xf32, #tpu.memory_space<vmem>>, vector<8x64xf32>
      %cst_12 = arith.constant dense<0.000000e+00> : vector<64xf32>
      %13 = vector.multi_reduction <add>, %12, %cst_12 [0] : vector<8x64xf32> to vector<64xf32>
      %14 = vector.shape_cast %13 : vector<64xf32> to vector<1x64xf32>
      %cst_13 = arith.constant 8.000000e+00 : f32
      %15 = vector.broadcast %cst_13 : f32 to vector<1x64xf32>
      %16 = arith.divf %14, %15 : vector<1x64xf32>
      %17 = vector.broadcast %16 : vector<1x64xf32> to vector<8x64xf32>
      %18 = arith.subf %12, %17 : vector<8x64xf32>
      %19 = vector.broadcast %16 : vector<1x64xf32> to vector<8x64xf32>
      %20 = arith.subf %12, %19 : vector<8x64xf32>
      %21 = arith.mulf %18, %20 : vector<8x64xf32>
      %cst_14 = arith.constant dense<0.000000e+00> : vector<64xf32>
      %22 = vector.multi_reduction <add>, %21, %cst_14 [0] : vector<8x64xf32> to vector<64xf32>
      %23 = vector.shape_cast %22 : vector<64xf32> to vector<1x64xf32>
      %cst_15 = arith.constant 8.000000e+00 : f32
      %24 = vector.broadcast %cst_15 : f32 to vector<1x64xf32>
      %25 = arith.divf %23, %24 : vector<1x64xf32>
      %26 = vector.broadcast %16 : vector<1x64xf32> to vector<8x64xf32>
      %27 = arith.subf %12, %26 : vector<8x64xf32>
      %cst_16 = arith.constant 9.99999974E-6 : f32
      %28 = vector.broadcast %cst_16 : f32 to vector<1x64xf32>
      %29 = arith.addf %25, %28 : vector<1x64xf32>
      %30 = math.rsqrt %29 : vector<1x64xf32>
      %31 = vector.broadcast %30 : vector<1x64xf32> to vector<8x64xf32>
      %32 = arith.mulf %27, %31 : vector<8x64xf32>
      %c0_17 = arith.constant 0 : index
      %c0_18 = arith.constant 0 : index
      %33 = vector.load %arg3[%c0_17, %c0_18] : memref<2x64xf32, #tpu.memory_space<vmem>>, vector<1x64xf32>
      %34 = vector.broadcast %33 : vector<1x64xf32> to vector<8x64xf32>
      %35 = arith.mulf %32, %34 : vector<8x64xf32>
      %c1 = arith.constant 1 : index
      %c0_19 = arith.constant 0 : index
      %36 = vector.load %arg3[%c1, %c0_19] : memref<2x64xf32, #tpu.memory_space<vmem>>, vector<1x64xf32>
      %37 = vector.broadcast %36 : vector<1x64xf32> to vector<8x64xf32>
      %38 = arith.addf %35, %37 : vector<8x64xf32>
      %cst_20 = arith.constant 0.000000e+00 : f32
      %39 = vector.broadcast %cst_20 : f32 to vector<8x64xf32>
      %40 = arith.maximumf %38, %39 : vector<8x64xf32>
      %c0_21 = arith.constant 0 : index
      %c0_22 = arith.constant 0 : index
      %41 = vector.load %arg4[%c0_21, %c0_22] : memref<64x32xf32, #tpu.memory_space<vmem>>, vector<64x32xf32>
      %cst_23 = arith.constant dense<0.000000e+00> : vector<8x32xf32>
      %42 = tpu.matmul %40, %41, %cst_23 {dimension_numbers = #tpu.dot_dimension_numbers<[1], [0], [0], [1], [0, 0, 1, 1], [], []>} : vector<8x64xf32>, vector<64x32xf32>, vector<8x32xf32> -> vector<8x32xf32>
      %cst_24 = arith.constant dense<0.000000e+00> : vector<32xf32>
      %43 = vector.multi_reduction <add>, %42, %cst_24 [0] : vector<8x32xf32> to vector<32xf32>
      %44 = vector.shape_cast %43 : vector<32xf32> to vector<1x32xf32>
      %cst_25 = arith.constant 8.000000e+00 : f32
      %45 = vector.broadcast %cst_25 : f32 to vector<1x32xf32>
      %46 = arith.divf %44, %45 : vector<1x32xf32>
      %47 = vector.broadcast %46 : vector<1x32xf32> to vector<8x32xf32>
      %48 = arith.subf %42, %47 : vector<8x32xf32>
      %49 = vector.broadcast %46 : vector<1x32xf32> to vector<8x32xf32>
      %50 = arith.subf %42, %49 : vector<8x32xf32>
      %51 = arith.mulf %48, %50 : vector<8x32xf32>
      %cst_26 = arith.constant dense<0.000000e+00> : vector<32xf32>
      %52 = vector.multi_reduction <add>, %51, %cst_26 [0] : vector<8x32xf32> to vector<32xf32>
      %53 = vector.shape_cast %52 : vector<32xf32> to vector<1x32xf32>
      %cst_27 = arith.constant 8.000000e+00 : f32
      %54 = vector.broadcast %cst_27 : f32 to vector<1x32xf32>
      %55 = arith.divf %53, %54 : vector<1x32xf32>
      %56 = vector.broadcast %46 : vector<1x32xf32> to vector<8x32xf32>
      %57 = arith.subf %42, %56 : vector<8x32xf32>
      %cst_28 = arith.constant 9.99999974E-6 : f32
      %58 = vector.broadcast %cst_28 : f32 to vector<1x32xf32>
      %59 = arith.addf %55, %58 : vector<1x32xf32>
      %60 = math.rsqrt %59 : vector<1x32xf32>
      %61 = vector.broadcast %60 : vector<1x32xf32> to vector<8x32xf32>
      %62 = arith.mulf %57, %61 : vector<8x32xf32>
      %c0_29 = arith.constant 0 : index
      %c0_30 = arith.constant 0 : index
      %63 = vector.load %arg5[%c0_29, %c0_30] : memref<2x32xf32, #tpu.memory_space<vmem>>, vector<1x32xf32>
      %64 = vector.broadcast %63 : vector<1x32xf32> to vector<8x32xf32>
      %65 = arith.mulf %62, %64 : vector<8x32xf32>
      %c1_31 = arith.constant 1 : index
      %c0_32 = arith.constant 0 : index
      %66 = vector.load %arg5[%c1_31, %c0_32] : memref<2x32xf32, #tpu.memory_space<vmem>>, vector<1x32xf32>
      %67 = vector.broadcast %66 : vector<1x32xf32> to vector<8x32xf32>
      %68 = arith.addf %65, %67 : vector<8x32xf32>
      %cst_33 = arith.constant 0.000000e+00 : f32
      %69 = vector.broadcast %cst_33 : f32 to vector<8x32xf32>
      %70 = arith.maximumf %68, %69 : vector<8x32xf32>
      %c0_34 = arith.constant 0 : index
      %c0_35 = arith.constant 0 : index
      %71 = vector.load %arg6[%c0_34, %c0_35] : memref<8x32xf32, #tpu.memory_space<vmem>>, vector<8x32xf32>
      tpu.vector_store %arg6[%c0_34, %c0_35], %70 {strides = array<i32>} : memref<8x32xf32, #tpu.memory_space<vmem>>, vector<8x32xf32>,
    } else {
    }
    return
  }
  func.func @transform_0(%arg0: i32) -> (i32, i32) {
    %c0_i32 = arith.constant 0 : i32
    %c0_i32_0 = arith.constant 0 : i32
    return %c0_i32, %arg0 : i32, i32
  }
  func.func @transform_1(%arg0: i32) -> (i32, i32) {
    %c0_i32 = arith.constant 0 : i32
    %c0_i32_0 = arith.constant 0 : i32
    return %arg0, %c0_i32 : i32, i32
  }
  func.func @transform_2(%arg0: i32) -> (i32, i32) {
    %c0_i32 = arith.constant 0 : i32
    %c0_i32_0 = arith.constant 0 : i32
    %c0_i32_1 = arith.constant 0 : i32
    return %c0_i32, %c0_i32_0 : i32, i32
  }
  func.func @transform_3(%arg0: i32) -> (i32, i32) {
    %c0_i32 = arith.constant 0 : i32
    %c0_i32_0 = arith.constant 0 : i32
    %c0_i32_1 = arith.constant 0 : i32
    return %c0_i32, %c0_i32_0 : i32, i32
  }
  func.func @transform_4(%arg0: i32) -> (i32, i32) {
    %c0_i32 = arith.constant 0 : i32
    %c0_i32_0 = arith.constant 0 : i32
    %c0_i32_1 = arith.constant 0 : i32
    return %c0_i32, %c0_i32_0 : i32, i32
  }
  func.func @transform_5(%arg0: i32) -> (i32, i32) {
    %c0_i32 = arith.constant 0 : i32
    %c0_i32_0 = arith.constant 0 : i32
    %c0_i32_1 = arith.constant 0 : i32
    return %c0_i32, %c0_i32_0 : i32, i32
  }
}

</mosaic_0001>

<bundles_post_ra>
// kernel: tpu_custom_call.1
= control target key start
LH: loop header
LB: loop body
LE: loop exit
PB: predicated region body
PF: predicated region fallthrough
CT: control target
= control target key end

     0   :  { %s3235_s0 = inlined_call_operand.vmem [shape: f32[8,3072], index: 0, kind: input, shape index: {}]   ;;  %s3236_s1 = inlined_call_operand.vmem [shape: f32[3072,64], index: 1, kind: input, shape index: {}]   ;;  %s3237_s2 = inlined_call_operand.vmem [shape: f32[2,64], index: 2, kind: input, shape index: {}]   ;;  %s3238_s3 = inlined_call_operand.vmem [shape: f32[64,32], index: 3, kind: input, shape index: {}]   ;;  %s3239_s4 = inlined_call_operand.vmem [shape: f32[2,32], index: 4, kind: input, shape index: {}]   ;;  %s3240_s5 = inlined_call_operand.hbm [shape: f32[8,32], index: 5, kind: output, shape index: {}]  }
   0x1   :  { %v83_v0 = vld [vmem:[%s3236_s1 + $0xf8] sm:$0xff]  ;;  %v82_v4 = vld [vmem:[%s3236_s1 + $0xf0] sm:$0xff]  ;;  %v81_v8 = vld [vmem:[%s3236_s1 + $0xe8] sm:$0xff] }
   0x2   :  { %v115_v1 = vld [vmem:[%s3236_s1 + $0x1f8] sm:$0xff]  ;;  %1454 = vmatprep.subr.mxu0 %v83_v0  ;;  %v114_v5 = vld [vmem:[%s3236_s1 + $0x1f0] sm:$0xff]  ;;  %v113_v9 = vld [vmem:[%s3236_s1 + $0x1e8] sm:$0xff] }
   0x3   :  { %v67_v2 = vld [vmem:[%s3236_s1 + $0x78] sm:$0xff]  ;;  %1489 = vmatprep.subr.mxu1 %v115_v1  ;;  %v66_v6 = vld [vmem:[%s3236_s1 + $0x70] sm:$0xff]  ;;  %v65_v10 = vld [vmem:[%s3236_s1 + $0x68] sm:$0xff] }
   0x4   :  { %v99_v3 = vld [vmem:[%s3236_s1 + $0x178] sm:$0xff]  ;;  %1455 = vmatpush3.msra.mxu0 %v67_v2  ;;  %v98_v7 = vld [vmem:[%s3236_s1 + $0x170] sm:$0xff]  ;;  %v97_v11 = vld [vmem:[%s3236_s1 + $0x168] sm:$0xff] }
   0x5   :  { %1490 = vmatpush3.msra.mxu1 %v99_v3  ;;  %1456 = vmatprep.subr.mxu0 %v82_v4  ;;  %v80_v12 = vld [vmem:[%s3236_s1 + $0xe0] sm:$0xff]  ;;  %v79_v16 = vld [vmem:[%s3236_s1 + $0xd8] sm:$0xff]  ;;  %v78_v20 = vld [vmem:[%s3236_s1 + $0xd0] sm:$0xff] }
   0x6   :  { %1491 = vmatprep.subr.mxu1 %v114_v5  ;;  %1457 = vmatpush3.msra.mxu0 %v66_v6  ;;  %v112_v13 = vld [vmem:[%s3236_s1 + $0x1e0] sm:$0xff]  ;;  %v111_v17 = vld [vmem:[%s3236_s1 + $0x1d8] sm:$0xff]  ;;  %v110_v21 = vld [vmem:[%s3236_s1 + $0x1d0] sm:$0xff] }
   0x7   :  { %1492 = vmatpush3.msra.mxu1 %v98_v7  ;;  %1458 = vmatprep.subr.mxu0 %v81_v8  ;;  %v64_v14 = vld [vmem:[%s3236_s1 + $0x60] sm:$0xff]  ;;  %v63_v18 = vld [vmem:[%s3236_s1 + $0x58] sm:$0xff]  ;;  %v62_v22 = vld [vmem:[%s3236_s1 + $0x50] sm:$0xff] }
   0x8   :  { %1493 = vmatprep.subr.mxu1 %v113_v9  ;;  %v96_v15 = vld [vmem:[%s3236_s1 + $0x160] sm:$0xff]  ;;  %1459 = vmatpush3.msra.mxu0 %v65_v10  ;;  %v95_v19 = vld [vmem:[%s3236_s1 + $0x158] sm:$0xff]  ;;  %v94_v23 = vld [vmem:[%s3236_s1 + $0x150] sm:$0xff] }
   0x9   :  { %1494 = vmatpush3.msra.mxu1 %v97_v11  ;;  %1460 = vmatprep.subr.mxu0 %v80_v12  ;;  %v77_v24 = vld [vmem:[%s3236_s1 + $0xc8] sm:$0xff]  ;;  %v76_v28 = vld [vmem:[%s3236_s1 + $0xc0] sm:$0xff]  ;;  %v75_v32 = vld [vmem:[%s3236_s1 + $0xb8] sm:$0xff] }
   0xa   :  { %1495 = vmatprep.subr.mxu1 %v112_v13  ;;  %1461 = vmatpush3.msra.mxu0 %v64_v14  ;;  %v109_v25 = vld [vmem:[%s3236_s1 + $0x1c8] sm:$0xff]  ;;  %v108_v29 = vld [vmem:[%s3236_s1 + $0x1c0] sm:$0xff]  ;;  %v107_v33 = vld [vmem:[%s3236_s1 + $0x1b8] sm:$0xff] }
   0xb   :  { %1496 = vmatpush3.msra.mxu1 %v96_v15  ;;  %1462 = vmatprep.subr.mxu0 %v79_v16  ;;  %v61_v26 = vld [vmem:[%s3236_s1 + $0x48] sm:$0xff]  ;;  %v60_v30 = vld [vmem:[%s3236_s1 + $0x40] sm:$0xff]  ;;  %v59_v34 = vld [vmem:[%s3236_s1 + $0x38] sm:$0xff] }
   0xc   :  { %1497 = vmatprep.subr.mxu1 %v111_v17  ;;  %1463 = vmatpush3.msra.mxu0 %v63_v18  ;;  %v93_v27 = vld [vmem:[%s3236_s1 + $0x148] sm:$0xff]  ;;  %v92_v31 = vld [vmem:[%s3236_s1 + $0x140] sm:$0xff]  ;;  %v91_v35 = vld [vmem:[%s3236_s1 + $0x138] sm:$0xff] }
   0xd   :  { %1498 = vmatpush3.msra.mxu1 %v95_v19  ;;  %1464 = vmatprep.subr.mxu0 %v78_v20  ;;  %v74_v36 = vld [vmem:[%s3236_s1 + $0xb0] sm:$0xff]  ;;  %v73_v40 = vld [vmem:[%s3236_s1 + $0xa8] sm:$0xff]  ;;  %v72_v44 = vld [vmem:[%s3236_s1 + $0xa0] sm:$0xff] }
   0xe   :  { %1499 = vmatprep.subr.mxu1 %v110_v21  ;;  %1465 = vmatpush3.msra.mxu0 %v62_v22  ;;  %v106_v37 = vld [vmem:[%s3236_s1 + $0x1b0] sm:$0xff]  ;;  %v105_v41 = vld [vmem:[%s3236_s1 + $0x1a8] sm:$0xff]  ;;  %v104_v45 = vld [vmem:[%s3236_s1 + $0x1a0] sm:$0xff] }
   0xf   :  { %1500 = vmatpush3.msra.mxu1 %v94_v23  ;;  %1466 = vmatprep.subr.mxu0 %v77_v24  ;;  %v58_v38 = vld [vmem:[%s3236_s1 + $0x30] sm:$0xff]  ;;  %v57_v42 = vld [vmem:[%s3236_s1 + $0x28] sm:$0xff]  ;;  %v56_v46 = vld [vmem:[%s3236_s1 + $0x20] sm:$0xff] }
  0x10   :  { %1501 = vmatprep.subr.mxu1 %v109_v25  ;;  %1467 = vmatpush3.msra.mxu0 %v61_v26  ;;  %v90_v39 = vld [vmem:[%s3236_s1 + $0x130] sm:$0xff]  ;;  %v89_v43 = vld [vmem:[%s3236_s1 + $0x128] sm:$0xff]  ;;  %v88_v47 = vld [vmem:[%s3236_s1 + $0x120] sm:$0xff] }
  0x11   :  { %1502 = vmatpush3.msra.mxu1 %v93_v27  ;;  %1468 = vmatprep.subr.mxu0 %v76_v28  ;;  %v71_v48 = vld [vmem:[%s3236_s1 + $0x98] sm:$0xff]  ;;  %v70_v52 = vld [vmem:[%s3236_s1 + $0x90] sm:$0xff]  ;;  %v69_v56 = vld [vmem:[%s3236_s1 + $0x88] sm:$0xff] }
  0x12   :  { %1503 = vmatprep.subr.mxu1 %v108_v29  ;;  %1469 = vmatpush3.msra.mxu0 %v60_v30  ;;  %v103_v49 = vld [vmem:[%s3236_s1 + $0x198] sm:$0xff]  ;;  %v102_v53 = vld [vmem:[%s3236_s1 + $0x190] sm:$0xff]  ;;  %v101_v57 = vld [vmem:[%s3236_s1 + $0x188] sm:$0xff] }
  0x13   :  { %1504 = vmatpush3.msra.mxu1 %v92_v31  ;;  %1470 = vmatprep.subr.mxu0 %v75_v32  ;;  %v55_v50 = vld [vmem:[%s3236_s1 + $0x18] sm:$0xff]  ;;  %v54_v54 = vld [vmem:[%s3236_s1 + $0x10] sm:$0xff]  ;;  %v53_v58 = vld [vmem:[%s3236_s1 + $0x8] sm:$0xff] }
  0x14   :  { %1505 = vmatprep.subr.mxu1 %v107_v33  ;;  %1471 = vmatpush3.msra.mxu0 %v59_v34  ;;  %v87_v51 = vld [vmem:[%s3236_s1 + $0x118] sm:$0xff]  ;;  %v86_v55 = vld [vmem:[%s3236_s1 + $0x110] sm:$0xff]  ;;  %v85_v59 = vld [vmem:[%s3236_s1 + $0x108] sm:$0xff] }
  0x15   :  { %1506 = vmatpush3.msra.mxu1 %v91_v35  ;;  %1472 = vmatprep.subr.mxu0 %v74_v36  ;;  %v68_v60 = vld [vmem:[%s3236_s1 + $0x80] sm:$0xff]  ;;  %v29_v63 = vld [vmem:[%s3235_s0 + $0x8] sm:$0xff]  ;;  %v31_v1 = vld [vmem:[%s3235_s0 + $0x18] sm:$0xff] }
  0x16   :  { %1507 = vmatprep.subr.mxu1 %v106_v37  ;;  %1473 = vmatpush3.msra.mxu0 %v58_v38  ;;  %v100_v61 = vld [vmem:[%s3236_s1 + $0x180] sm:$0xff]  ;;  %v30_v3 = vld [vmem:[%s3235_s0 + $0x10] sm:$0xff]  ;;  %v147_v4 = vld [vmem:[%s3236_s1 + $0x2f8] sm:$0xff] }
  0x17   :  { %1508 = vmatpush3.msra.mxu1 %v90_v39  ;;  %1474 = vmatprep.subr.mxu0 %v73_v40  ;;  %v52_v62 = vld [vmem:[%s3236_s1] sm:$0xff]  ;;  %v179_v5 = vld [vmem:[%s3236_s1 + $0x3f8] sm:$0xff]  ;;  %v146_v8 = vld [vmem:[%s3236_s1 + $0x2f0] sm:$0xff] }
  0x18   :  { %1509 = vmatprep.subr.mxu1 %v105_v41  ;;  %1475 = vmatpush3.msra.mxu0 %v57_v42  ;;  %v84_v0 = vld [vmem:[%s3236_s1 + $0x100] sm:$0xff]  ;;  %v131_v6 = vld [vmem:[%s3236_s1 + $0x278] sm:$0xff]  ;;  %v178_v9 = vld [vmem:[%s3236_s1 + $0x3f0] sm:$0xff] }
  0x19   :  { %1510 = vmatpush3.msra.mxu1 %v89_v43  ;;  %1476 = vmatprep.subr.mxu0 %v72_v44  ;;  %v28_v2 = vld [vmem:[%s3235_s0] sm:$0xff]  ;;  %v163_v7 = vld [vmem:[%s3236_s1 + $0x378] sm:$0xff]  ;;  %v130_v10 = vld [vmem:[%s3236_s1 + $0x270] sm:$0xff] }
  0x1a   :  { %1511 = vmatprep.subr.mxu1 %v104_v45  ;;  %1477 = vmatpush3.msra.mxu0 %v56_v46  ;;  %v162_v11 = vld [vmem:[%s3236_s1 + $0x370] sm:$0xff]  ;;  %v145_v12 = vld [vmem:[%s3236_s1 + $0x2e8] sm:$0xff]  ;;  %v144_v16 = vld [vmem:[%s3236_s1 + $0x2e0] sm:$0xff] }
  0x1b   :  { %1512 = vmatpush3.msra.mxu1 %v88_v47  ;;  %1478 = vmatprep.subr.mxu0 %v71_v48  ;;  %v177_v13 = vld [vmem:[%s3236_s1 + $0x3e8] sm:$0xff]  ;;  %v176_v17 = vld [vmem:[%s3236_s1 + $0x3e0] sm:$0xff]  ;;  %v143_v20 = vld [vmem:[%s3236_s1 + $0x2d8] sm:$0xff] }
  0x1c   :  { %1513 = vmatprep.subr.mxu1 %v103_v49  ;;  %1479 = vmatpush3.msra.mxu0 %v55_v50  ;;  %v129_v14 = vld [vmem:[%s3236_s1 + $0x268] sm:$0xff]  ;;  %v128_v18 = vld [vmem:[%s3236_s1 + $0x260] sm:$0xff]  ;;  %v175_v21 = vld [vmem:[%s3236_s1 + $0x3d8] sm:$0xff] }
  0x1d   :  { %1514 = vmatpush3.msra.mxu1 %v87_v51  ;;  %1480 = vmatprep.subr.mxu0 %v70_v52  ;;  %v161_v15 = vld [vmem:[%s3236_s1 + $0x368] sm:$0xff]  ;;  %v160_v19 = vld [vmem:[%s3236_s1 + $0x360] sm:$0xff]  ;;  %v127_v22 = vld [vmem:[%s3236_s1 + $0x258] sm:$0xff] }
  0x1e   :  { %1515 = vmatprep.subr.mxu1 %v102_v53  ;;  %1481 = vmatpush3.msra.mxu0 %v54_v54  ;;  %v159_v23 = vld [vmem:[%s3236_s1 + $0x358] sm:$0xff]  ;;  %v142_v24 = vld [vmem:[%s3236_s1 + $0x2d0] sm:$0xff]  ;;  %v141_v28 = vld [vmem:[%s3236_s1 + $0x2c8] sm:$0xff] }
  0x1f   :  { %1516 = vmatpush3.msra.mxu1 %v86_v55  ;;  %1482 = vmatprep.subr.mxu0 %v69_v56  ;;  %v174_v25 = vld [vmem:[%s3236_s1 + $0x3d0] sm:$0xff]  ;;  %v173_v29 = vld [vmem:[%s3236_s1 + $0x3c8] sm:$0xff]  ;;  %v140_v32 = vld [vmem:[%s3236_s1 + $0x2c0] sm:$0xff] }
  0x20   :  { %1517 = vmatprep.subr.mxu1 %v101_v57  ;;  %1483 = vmatpush3.msra.mxu0 %v53_v58  ;;  %v126_v26 = vld [vmem:[%s3236_s1 + $0x250] sm:$0xff]  ;;  %v125_v30 = vld [vmem:[%s3236_s1 + $0x248] sm:$0xff]  ;;  %v172_v33 = vld [vmem:[%s3236_s1 + $0x3c0] sm:$0xff] }
  0x21   :  { %1518 = vmatpush3.msra.mxu1 %v85_v59  ;;  %1484 = vmatprep.subr.mxu0 %v68_v60  ;;  %v158_v27 = vld [vmem:[%s3236_s1 + $0x350] sm:$0xff]  ;;  %v157_v31 = vld [vmem:[%s3236_s1 + $0x348] sm:$0xff]  ;;  %v124_v34 = vld [vmem:[%s3236_s1 + $0x240] sm:$0xff] }
  0x22   :  { %1519 = vmatprep.subr.mxu1 %v100_v61  ;;  %1485 = vmatpush3.msra.mxu0 %v52_v62  ;;  %v156_v35 = vld [vmem:[%s3236_s1 + $0x340] sm:$0xff]  ;;  %v139_v36 = vld [vmem:[%s3236_s1 + $0x2b8] sm:$0xff]  ;;  %v138_v40 = vld [vmem:[%s3236_s1 + $0x2b0] sm:$0xff] }
  0x23   :  { %500 = vmatprep.mubr.f32.mxu0 %v29_v63  ;;  %1520 = vmatpush3.msra.mxu1 %v84_v0  ;;  %v171_v37 = vld [vmem:[%s3236_s1 + $0x3b8] sm:$0xff]  ;;  %v170_v41 = vld [vmem:[%s3236_s1 + $0x3b0] sm:$0xff]  ;;  %v137_v44 = vld [vmem:[%s3236_s1 + $0x2a8] sm:$0xff] }
  0x24   :  { %570 = vmatprep.mubr.f32.mxu1 %v31_v1  ;;  %501 = vmatmul.mubr.f32.vlgmr.msra.gmra.mxu0 %v28_v2  ;;  %v123_v38 = vld [vmem:[%s3236_s1 + $0x238] sm:$0xff]  ;;  %v122_v42 = vld [vmem:[%s3236_s1 + $0x230] sm:$0xff]  ;;  %v169_v45 = vld [vmem:[%s3236_s1 + $0x3a8] sm:$0xff] }
  0x25   :  { %571 = vmatmul.mubr.f32.vlgmr.msra.gmra.mxu1 %v30_v3  ;;  %1524 = vmatprep.subr.mxu0 %v147_v4  ;;  %v155_v39 = vld [vmem:[%s3236_s1 + $0x338] sm:$0xff]  ;;  %v154_v43 = vld [vmem:[%s3236_s1 + $0x330] sm:$0xff]  ;;  %v121_v46 = vld [vmem:[%s3236_s1 + $0x228] sm:$0xff] }
  0x26   :  { %1559 = vmatprep.subr.mxu1 %v179_v5  ;;  %1525 = vmatpush3.msra.mxu0 %v131_v6  ;;  %v153_v47 = vld [vmem:[%s3236_s1 + $0x328] sm:$0xff]  ;;  %v136_v48 = vld [vmem:[%s3236_s1 + $0x2a0] sm:$0xff]  ;;  %v135_v52 = vld [vmem:[%s3236_s1 + $0x298] sm:$0xff] }
  0x27   :  { %1560 = vmatpush3.msra.mxu1 %v163_v7  ;;  %1526 = vmatprep.subr.mxu0 %v146_v8  ;;  %v168_v49 = vld [vmem:[%s3236_s1 + $0x3a0] sm:$0xff]  ;;  %v167_v53 = vld [vmem:[%s3236_s1 + $0x398] sm:$0xff]  ;;  %v134_v56 = vld [vmem:[%s3236_s1 + $0x290] sm:$0xff] }
  0x28   :  { %1561 = vmatprep.subr.mxu1 %v178_v9  ;;  %1527 = vmatpush3.msra.mxu0 %v130_v10  ;;  %v120_v50 = vld [vmem:[%s3236_s1 + $0x220] sm:$0xff]  ;;  %v119_v54 = vld [vmem:[%s3236_s1 + $0x218] sm:$0xff]  ;;  %v166_v57 = vld [vmem:[%s3236_s1 + $0x390] sm:$0xff] }
  0x29   :  { %1562 = vmatpush3.msra.mxu1 %v162_v11  ;;  %1528 = vmatprep.subr.mxu0 %v145_v12  ;;  %v152_v51 = vld [vmem:[%s3236_s1 + $0x320] sm:$0xff]  ;;  %v151_v55 = vld [vmem:[%s3236_s1 + $0x318] sm:$0xff]  ;;  %v118_v58 = vld [vmem:[%s3236_s1 + $0x210] sm:$0xff] }
  0x2a   :  { %1563 = vmatprep.subr.mxu1 %v177_v13  ;;  %1529 = vmatpush3.msra.mxu0 %v129_v14  ;;  %v150_v59 = vld [vmem:[%s3236_s1 + $0x310] sm:$0xff]  ;;  %v133_v60 = vld [vmem:[%s3236_s1 + $0x288] sm:$0xff]  ;;  %v132_v0 = vld [vmem:[%s3236_s1 + $0x280] sm:$0xff] }
  0x2b   :  { %1564 = vmatpush3.msra.mxu1 %v161_v15  ;;  %1530 = vmatprep.subr.mxu0 %v144_v16  ;;  %v165_v61 = vld [vmem:[%s3236_s1 + $0x388] sm:$0xff]  ;;  %v164_v1 = vld [vmem:[%s3236_s1 + $0x380] sm:$0xff]  ;;  %v35_v6 = vld [vmem:[%s3235_s0 + $0x38] sm:$0xff] }
  0x2c   :  { %1565 = vmatprep.subr.mxu1 %v176_v17  ;;  %1531 = vmatpush3.msra.mxu0 %v128_v18  ;;  %v117_v62 = vld [vmem:[%s3236_s1 + $0x208] sm:$0xff]  ;;  %v116_v2 = vld [vmem:[%s3236_s1 + $0x200] sm:$0xff]  ;;  %v211_v7 = vld [vmem:[%s3236_s1 + $0x4f8] sm:$0xff] }
  0x2d   :  { %1566 = vmatpush3.msra.mxu1 %v160_v19  ;;  %1532 = vmatprep.subr.mxu0 %v143_v20  ;;  %v149_v63 = vld [vmem:[%s3236_s1 + $0x308] sm:$0xff]  ;;  %v148_v4 = vld [vmem:[%s3236_s1 + $0x300] sm:$0xff]  ;;  %v243_v8 = vld [vmem:[%s3236_s1 + $0x5f8] sm:$0xff] }
  0x2e   :  { %1567 = vmatprep.subr.mxu1 %v175_v21  ;;  %1533 = vmatpush3.msra.mxu0 %v127_v22  ;;  %v33_v3 = vld [vmem:[%s3235_s0 + $0x28] sm:$0xff]  ;;  %v32_v5 = vld [vmem:[%s3235_s0 + $0x20] sm:$0xff]  ;;  %v34_v9 = vld [vmem:[%s3235_s0 + $0x30] sm:$0xff] }
  0x2f   :  { %1568 = vmatpush3.msra.mxu1 %v159_v23  ;;  %1534 = vmatprep.subr.mxu0 %v142_v24  ;;  %v195_v10 = vld [vmem:[%s3236_s1 + $0x478] sm:$0xff]  ;;  %v210_v12 = vld [vmem:[%s3236_s1 + $0x4f0] sm:$0xff]  ;;  %v209_v16 = vld [vmem:[%s3236_s1 + $0x4e8] sm:$0xff] }
  0x30   :  { %1569 = vmatprep.subr.mxu1 %v174_v25  ;;  %1535 = vmatpush3.msra.mxu0 %v126_v26  ;;  %v227_v11 = vld [vmem:[%s3236_s1 + $0x578] sm:$0xff]  ;;  %v242_v13 = vld [vmem:[%s3236_s1 + $0x5f0] sm:$0xff]  ;;  %v241_v17 = vld [vmem:[%s3236_s1 + $0x5e8] sm:$0xff] }
  0x31   :  { %1570 = vmatpush3.msra.mxu1 %v158_v27  ;;  %1536 = vmatprep.subr.mxu0 %v141_v28  ;;  %v194_v14 = vld [vmem:[%s3236_s1 + $0x470] sm:$0xff]  ;;  %v193_v18 = vld [vmem:[%s3236_s1 + $0x468] sm:$0xff]  ;;  %v208_v20 = vld [vmem:[%s3236_s1 + $0x4e0] sm:$0xff] }
  0x32   :  { %1571 = vmatprep.subr.mxu1 %v173_v29  ;;  %1537 = vmatpush3.msra.mxu0 %v125_v30  ;;  %v226_v15 = vld [vmem:[%s3236_s1 + $0x570] sm:$0xff]  ;;  %v225_v19 = vld [vmem:[%s3236_s1 + $0x568] sm:$0xff]  ;;  %v240_v21 = vld [vmem:[%s3236_s1 + $0x5e0] sm:$0xff] }
  0x33   :  { %1572 = vmatpush3.msra.mxu1 %v157_v31  ;;  %1538 = vmatprep.subr.mxu0 %v140_v32  ;;  %v192_v22 = vld [vmem:[%s3236_s1 + $0x460] sm:$0xff]  ;;  %v207_v24 = vld [vmem:[%s3236_s1 + $0x4d8] sm:$0xff]  ;;  %v206_v28 = vld [vmem:[%s3236_s1 + $0x4d0] sm:$0xff] }
  0x34   :  { %1573 = vmatprep.subr.mxu1 %v172_v33  ;;  %1539 = vmatpush3.msra.mxu0 %v124_v34  ;;  %v224_v23 = vld [vmem:[%s3236_s1 + $0x560] sm:$0xff]  ;;  %v239_v25 = vld [vmem:[%s3236_s1 + $0x5d8] sm:$0xff]  ;;  %v238_v29 = vld [vmem:[%s3236_s1 + $0x5d0] sm:$0xff] }
  0x35   :  { %1574 = vmatpush3.msra.mxu1 %v156_v35  ;;  %1540 = vmatprep.subr.mxu0 %v139_v36  ;;  %v191_v26 = vld [vmem:[%s3236_s1 + $0x458] sm:$0xff]  ;;  %v190_v30 = vld [vmem:[%s3236_s1 + $0x450] sm:$0xff]  ;;  %v205_v32 = vld [vmem:[%s3236_s1 + $0x4c8] sm:$0xff] }
  0x36   :  { %1575 = vmatprep.subr.mxu1 %v171_v37  ;;  %1541 = vmatpush3.msra.mxu0 %v123_v38  ;;  %v223_v27 = vld [vmem:[%s3236_s1 + $0x558] sm:$0xff]  ;;  %v222_v31 = vld [vmem:[%s3236_s1 + $0x550] sm:$0xff]  ;;  %v237_v33 = vld [vmem:[%s3236_s1 + $0x5c8] sm:$0xff] }
  0x37   :  { %1576 = vmatpush3.msra.mxu1 %v155_v39  ;;  %1542 = vmatprep.subr.mxu0 %v138_v40  ;;  %v189_v34 = vld [vmem:[%s3236_s1 + $0x448] sm:$0xff]  ;;  %v204_v36 = vld [vmem:[%s3236_s1 + $0x4c0] sm:$0xff]  ;;  %v203_v40 = vld [vmem:[%s3236_s1 + $0x4b8] sm:$0xff] }
  0x38   :  { %1577 = vmatprep.subr.mxu1 %v170_v41  ;;  %1543 = vmatpush3.msra.mxu0 %v122_v42  ;;  %v221_v35 = vld [vmem:[%s3236_s1 + $0x548] sm:$0xff]  ;;  %v236_v37 = vld [vmem:[%s3236_s1 + $0x5c0] sm:$0xff]  ;;  %v235_v41 = vld [vmem:[%s3236_s1 + $0x5b8] sm:$0xff] }
  0x39   :  { %1578 = vmatpush3.msra.mxu1 %v154_v43  ;;  %1544 = vmatprep.subr.mxu0 %v137_v44  ;;  %v188_v38 = vld [vmem:[%s3236_s1 + $0x440] sm:$0xff]  ;;  %v187_v42 = vld [vmem:[%s3236_s1 + $0x438] sm:$0xff]  ;;  %v202_v44 = vld [vmem:[%s3236_s1 + $0x4b0] sm:$0xff] }
  0x3a   :  { %1579 = vmatprep.subr.mxu1 %v169_v45  ;;  %1545 = vmatpush3.msra.mxu0 %v121_v46  ;;  %v220_v39 = vld [vmem:[%s3236_s1 + $0x540] sm:$0xff]  ;;  %v219_v43 = vld [vmem:[%s3236_s1 + $0x538] sm:$0xff]  ;;  %v234_v45 = vld [vmem:[%s3236_s1 + $0x5b0] sm:$0xff] }
  0x3b   :  { %1580 = vmatpush3.msra.mxu1 %v153_v47  ;;  %1546 = vmatprep.subr.mxu0 %v136_v48  ;;  %v186_v46 = vld [vmem:[%s3236_s1 + $0x430] sm:$0xff]  ;;  %v201_v48 = vld [vmem:[%s3236_s1 + $0x4a8] sm:$0xff] }
  0x3c   :  { %1581 = vmatprep.subr.mxu1 %v168_v49  ;;  %1547 = vmatpush3.msra.mxu0 %v120_v50  ;;  %v218_v47 = vld [vmem:[%s3236_s1 + $0x530] sm:$0xff]  ;;  %v233_v49 = vld [vmem:[%s3236_s1 + $0x5a8] sm:$0xff] }
  0x3d   :  { %1582 = vmatpush3.msra.mxu1 %v152_v51  ;;  %1548 = vmatprep.subr.mxu0 %v135_v52  ;;  %v185_v50 = vld [vmem:[%s3236_s1 + $0x428] sm:$0xff]  ;;  %v200_v52 = vld [vmem:[%s3236_s1 + $0x4a0] sm:$0xff] }
  0x3e   :  { %1583 = vmatprep.subr.mxu1 %v167_v53  ;;  %1549 = vmatpush3.msra.mxu0 %v119_v54  ;;  %v217_v51 = vld [vmem:[%s3236_s1 + $0x528] sm:$0xff]  ;;  %v232_v53 = vld [vmem:[%s3236_s1 + $0x5a0] sm:$0xff] }
  0x3f   :  { %1584 = vmatpush3.msra.mxu1 %v151_v55  ;;  %1550 = vmatprep.subr.mxu0 %v134_v56  ;;  %v184_v54 = vld [vmem:[%s3236_s1 + $0x420] sm:$0xff]  ;;  %v199_v56 = vld [vmem:[%s3236_s1 + $0x498] sm:$0xff] }
  0x40   :  { %1585 = vmatprep.subr.mxu1 %v166_v57  ;;  %1551 = vmatpush3.msra.mxu0 %v118_v58  ;;  %v216_v55 = vld [vmem:[%s3236_s1 + $0x520] sm:$0xff]  ;;  %v231_v57 = vld [vmem:[%s3236_s1 + $0x598] sm:$0xff] }
  0x41   :  { %1586 = vmatpush3.msra.mxu1 %v150_v59  ;;  %1552 = vmatprep.subr.mxu0 %v133_v60  ;;  %v183_v58 = vld [vmem:[%s3236_s1 + $0x418] sm:$0xff]  ;;  %v198_v60 = vld [vmem:[%s3236_s1 + $0x490] sm:$0xff] }
  0x42   :  { %1587 = vmatprep.subr.mxu1 %v165_v61  ;;  %1553 = vmatpush3.msra.mxu0 %v117_v62  ;;  %v215_v59 = vld [vmem:[%s3236_s1 + $0x518] sm:$0xff]  ;;  %v230_v61 = vld [vmem:[%s3236_s1 + $0x590] sm:$0xff] }
  0x43   :  { %1588 = vmatpush3.msra.mxu1 %v149_v63  ;;  %1554 = vmatprep.subr.mxu0 %v132_v0  ;;  %v182_v62 = vld [vmem:[%s3236_s1 + $0x410] sm:$0xff]  ;;  %v197_v0 = vld [vmem:[%s3236_s1 + $0x488] sm:$0xff] }
  0x44   :  { %1589 = vmatprep.subr.mxu1 %v164_v1  ;;  %1555 = vmatpush3.msra.mxu0 %v116_v2  ;;  %v214_v63 = vld [vmem:[%s3236_s1 + $0x510] sm:$0xff]  ;;  %v229_v1 = vld [vmem:[%s3236_s1 + $0x588] sm:$0xff] }
  0x45   :  { %640 = vmatprep.mubr.f32.mxu0 %v33_v3  ;;  %1590 = vmatpush3.msra.mxu1 %v148_v4  ;;  %v181_v2 = vld [vmem:[%s3236_s1 + $0x408] sm:$0xff]  ;;  %v196_v4 = vld [vmem:[%s3236_s1 + $0x480] sm:$0xff] }
  0x46   :  { %641 = vmatmul.mubr.f32.vlgmr.msra.gmra.mxu0 %v32_v5  ;;  %710 = vmatprep.mubr.f32.mxu1 %v35_v6  ;;  %v213_v3 = vld [vmem:[%s3236_s1 + $0x508] sm:$0xff]  ;;  %v228_v5 = vld [vmem:[%s3236_s1 + $0x580] sm:$0xff] }
  0x47   :  { %1594 = vmatprep.subr.mxu0 %v211_v7  ;;  %1629 = vmatprep.subr.mxu1 %v243_v8  ;;  %v180_v6 = vld [vmem:[%s3236_s1 + $0x400] sm:$0xff]  ;;  %v37_v7 = vld [vmem:[%s3235_s0 + $0x48] sm:$0xff] }
  0x48   :  { %711 = vmatmul.mubr.f32.vlgmr.msra.gmra.mxu1 %v34_v9  ;;  %1595 = vmatpush3.msra.mxu0 %v195_v10  ;;  %v212_v8 = vld [vmem:[%s3236_s1 + $0x500] sm:$0xff]  ;;  %v39_v10 = vld [vmem:[%s3235_s0 + $0x58] sm:$0xff] }
  0x49   :  { %1630 = vmatpush3.msra.mxu1 %v227_v11  ;;  %1596 = vmatprep.subr.mxu0 %v210_v12  ;;  %v36_v9 = vld [vmem:[%s3235_s0 + $0x40] sm:$0xff]  ;;  %v275_v11 = vld [vmem:[%s3236_s1 + $0x6f8] sm:$0xff] }
  0x4a   :  { %1631 = vmatprep.subr.mxu1 %v242_v13  ;;  %1597 = vmatpush3.msra.mxu0 %v194_v14  ;;  %v307_v12 = vld [vmem:[%s3236_s1 + $0x7f8] sm:$0xff]  ;;  %v38_v13 = vld [vmem:[%s3235_s0 + $0x50] sm:$0xff] }
  0x4b   :  { %1632 = vmatpush3.msra.mxu1 %v226_v15  ;;  %1598 = vmatprep.subr.mxu0 %v209_v16  ;;  %v259_v14 = vld [vmem:[%s3236_s1 + $0x678] sm:$0xff]  ;;  %v274_v16 = vld [vmem:[%s3236_s1 + $0x6f0] sm:$0xff] }
  0x4c   :  { %1633 = vmatprep.subr.mxu1 %v241_v17  ;;  %1599 = vmatpush3.msra.mxu0 %v193_v18  ;;  %v291_v15 = vld [vmem:[%s3236_s1 + $0x778] sm:$0xff]  ;;  %v306_v17 = vld [vmem:[%s3236_s1 + $0x7f0] sm:$0xff] }
  0x4d   :  { %1634 = vmatpush3.msra.mxu1 %v225_v19  ;;  %1600 = vmatprep.subr.mxu0 %v208_v20  ;;  %v258_v18 = vld [vmem:[%s3236_s1 + $0x670] sm:$0xff]  ;;  %v273_v20 = vld [vmem:[%s3236_s1 + $0x6e8] sm:$0xff] }
  0x4e   :  { %1635 = vmatprep.subr.mxu1 %v240_v21  ;;  %1601 = vmatpush3.msra.mxu0 %v192_v22  ;;  %v290_v19 = vld [vmem:[%s3236_s1 + $0x770] sm:$0xff]  ;;  %v305_v21 = vld [vmem:[%s3236_s1 + $0x7e8] sm:$0xff] }
  0x4f   :  { %1636 = vmatpush3.msra.mxu1 %v224_v23  ;;  %1602 = vmatprep.subr.mxu0 %v207_v24  ;;  %v257_v22 = vld [vmem:[%s3236_s1 + $0x668] sm:$0xff]  ;;  %v272_v24 = vld [vmem:[%s3236_s1 + $0x6e0] sm:$0xff] }
  0x50   :  { %1637 = vmatprep.subr.mxu1 %v239_v25  ;;  %1603 = vmatpush3.msra.mxu0 %v191_v26  ;;  %v289_v23 = vld [vmem:[%s3236_s1 + $0x768] sm:$0xff]  ;;  %v304_v25 = vld [vmem:[%s3236_s1 + $0x7e0] sm:$0xff] }
  0x51   :  { %1638 = vmatpush3.msra.mxu1 %v223_v27  ;;  %1604 = vmatprep.subr.mxu0 %v206_v28  ;;  %v256_v26 = vld [vmem:[%s3236_s1 + $0x660] sm:$0xff]  ;;  %v271_v28 = vld [vmem:[%s3236_s1 + $0x6d8] sm:$0xff] }
  0x52   :  { %1639 = vmatprep.subr.mxu1 %v238_v29  ;;  %1605 = vmatpush3.msra.mxu0 %v190_v30  ;;  %v288_v27 = vld [vmem:[%s3236_s1 + $0x760] sm:$0xff]  ;;  %v303_v29 = vld [vmem:[%s3236_s1 + $0x7d8] sm:$0xff] }
  0x53   :  { %1640 = vmatpush3.msra.mxu1 %v222_v31  ;;  %1606 = vmatprep.subr.mxu0 %v205_v32  ;;  %v255_v30 = vld [vmem:[%s3236_s1 + $0x658] sm:$0xff]  ;;  %v270_v32 = vld [vmem:[%s3236_s1 + $0x6d0] sm:$0xff] }
  0x54   :  { %1641 = vmatprep.subr.mxu1 %v237_v33  ;;  %1607 = vmatpush3.msra.mxu0 %v189_v34  ;;  %v287_v31 = vld [vmem:[%s3236_s1 + $0x758] sm:$0xff]  ;;  %v302_v33 = vld [vmem:[%s3236_s1 + $0x7d0] sm:$0xff] }
  0x55   :  { %1642 = vmatpush3.msra.mxu1 %v221_v35  ;;  %1608 = vmatprep.subr.mxu0 %v204_v36  ;;  %v254_v34 = vld [vmem:[%s3236_s1 + $0x650] sm:$0xff]  ;;  %v269_v36 = vld [vmem:[%s3236_s1 + $0x6c8] sm:$0xff] }
  0x56   :  { %1643 = vmatprep.subr.mxu1 %v236_v37  ;;  %1609 = vmatpush3.msra.mxu0 %v188_v38  ;;  %v286_v35 = vld [vmem:[%s3236_s1 + $0x750] sm:$0xff]  ;;  %v301_v37 = vld [vmem:[%s3236_s1 + $0x7c8] sm:$0xff] }
  0x57   :  { %1644 = vmatpush3.msra.mxu1 %v220_v39  ;;  %1610 = vmatprep.subr.mxu0 %v203_v40  ;;  %v253_v38 = vld [vmem:[%s3236_s1 + $0x648] sm:$0xff]  ;;  %v268_v40 = vld [vmem:[%s3236_s1 + $0x6c0] sm:$0xff] }
  0x58   :  { %1645 = vmatprep.subr.mxu1 %v235_v41  ;;  %1611 = vmatpush3.msra.mxu0 %v187_v42  ;;  %v285_v39 = vld [vmem:[%s3236_s1 + $0x748] sm:$0xff]  ;;  %v300_v41 = vld [vmem:[%s3236_s1 + $0x7c0] sm:$0xff] }
  0x59   :  { %1646 = vmatpush3.msra.mxu1 %v219_v43  ;;  %1612 = vmatprep.subr.mxu0 %v202_v44  ;;  %v252_v42 = vld [vmem:[%s3236_s1 + $0x640] sm:$0xff]  ;;  %v267_v44 = vld [vmem:[%s3236_s1 + $0x6b8] sm:$0xff] }
  0x5a   :  { %1647 = vmatprep.subr.mxu1 %v234_v45  ;;  %1613 = vmatpush3.msra.mxu0 %v186_v46  ;;  %v284_v43 = vld [vmem:[%s3236_s1 + $0x740] sm:$0xff]  ;;  %v299_v45 = vld [vmem:[%s3236_s1 + $0x7b8] sm:$0xff] }
  0x5b   :  { %1648 = vmatpush3.msra.mxu1 %v218_v47  ;;  %1614 = vmatprep.subr.mxu0 %v201_v48  ;;  %v251_v46 = vld [vmem:[%s3236_s1 + $0x638] sm:$0xff]  ;;  %v266_v48 = vld [vmem:[%s3236_s1 + $0x6b0] sm:$0xff] }
  0x5c   :  { %1649 = vmatprep.subr.mxu1 %v233_v49  ;;  %1615 = vmatpush3.msra.mxu0 %v185_v50  ;;  %v283_v47 = vld [vmem:[%s3236_s1 + $0x738] sm:$0xff]  ;;  %v298_v49 = vld [vmem:[%s3236_s1 + $0x7b0] sm:$0xff] }
  0x5d   :  { %1650 = vmatpush3.msra.mxu1 %v217_v51  ;;  %1616 = vmatprep.subr.mxu0 %v200_v52  ;;  %v250_v50 = vld [vmem:[%s3236_s1 + $0x630] sm:$0xff]  ;;  %v265_v52 = vld [vmem:[%s3236_s1 + $0x6a8] sm:$0xff] }
  0x5e   :  { %1651 = vmatprep.subr.mxu1 %v232_v53  ;;  %1617 = vmatpush3.msra.mxu0 %v184_v54  ;;  %v282_v51 = vld [vmem:[%s3236_s1 + $0x730] sm:$0xff]  ;;  %v297_v53 = vld [vmem:[%s3236_s1 + $0x7a8] sm:$0xff] }
  0x5f   :  { %1652 = vmatpush3.msra.mxu1 %v216_v55  ;;  %1618 = vmatprep.subr.mxu0 %v199_v56  ;;  %v249_v54 = vld [vmem:[%s3236_s1 + $0x628] sm:$0xff]  ;;  %v264_v56 = vld [vmem:[%s3236_s1 + $0x6a0] sm:$0xff] }
  0x60   :  { %1653 = vmatprep.subr.mxu1 %v231_v57  ;;  %1619 = vmatpush3.msra.mxu0 %v183_v58  ;;  %v281_v55 = vld [vmem:[%s3236_s1 + $0x728] sm:$0xff]  ;;  %v296_v57 = vld [vmem:[%s3236_s1 + $0x7a0] sm:$0xff] }
  0x61   :  { %1654 = vmatpush3.msra.mxu1 %v215_v59  ;;  %1620 = vmatprep.subr.mxu0 %v198_v60  ;;  %v248_v58 = vld [vmem:[%s3236_s1 + $0x620] sm:$0xff]  ;;  %v263_v60 = vld [vmem:[%s3236_s1 + $0x698] sm:$0xff] }
  0x62   :  { %1655 = vmatprep.subr.mxu1 %v230_v61  ;;  %1621 = vmatpush3.msra.mxu0 %v182_v62  ;;  %v280_v59 = vld [vmem:[%s3236_s1 + $0x720] sm:$0xff]  ;;  %v295_v61 = vld [vmem:[%s3236_s1 + $0x798] sm:$0xff] }
  0x63   :  { %1656 = vmatpush3.msra.mxu1 %v214_v63  ;;  %1622 = vmatprep.subr.mxu0 %v197_v0  ;;  %v247_v62 = vld [vmem:[%s3236_s1 + $0x618] sm:$0xff]  ;;  %v262_v0 = vld [vmem:[%s3236_s1 + $0x690] sm:$0xff] }
  0x64   :  { %1657 = vmatprep.subr.mxu1 %v229_v1  ;;  %1623 = vmatpush3.msra.mxu0 %v181_v2  ;;  %v279_v63 = vld [vmem:[%s3236_s1 + $0x718] sm:$0xff]  ;;  %v294_v1 = vld [vmem:[%s3236_s1 + $0x790] sm:$0xff] }
  0x65   :  { %1658 = vmatpush3.msra.mxu1 %v213_v3  ;;  %1624 = vmatprep.subr.mxu0 %v196_v4  ;;  %v246_v2 = vld [vmem:[%s3236_s1 + $0x610] sm:$0xff]  ;;  %v261_v4 = vld [vmem:[%s3236_s1 + $0x688] sm:$0xff] }
  0x66   :  { %1659 = vmatprep.subr.mxu1 %v228_v5  ;;  %1625 = vmatpush3.msra.mxu0 %v180_v6  ;;  %v278_v3 = vld [vmem:[%s3236_s1 + $0x710] sm:$0xff]  ;;  %v293_v5 = vld [vmem:[%s3236_s1 + $0x788] sm:$0xff] }
  0x67   :  { %780 = vmatprep.mubr.f32.mxu0 %v37_v7  ;;  %1660 = vmatpush3.msra.mxu1 %v212_v8  ;;  %v245_v6 = vld [vmem:[%s3236_s1 + $0x608] sm:$0xff]  ;;  %v260_v8 = vld [vmem:[%s3236_s1 + $0x680] sm:$0xff] }
  0x68   :  { %781 = vmatmul.mubr.f32.vlgmr.msra.gmra.mxu0 %v36_v9  ;;  %850 = vmatprep.mubr.f32.mxu1 %v39_v10  ;;  %v277_v7 = vld [vmem:[%s3236_s1 + $0x708] sm:$0xff]  ;;  %v292_v9 = vld [vmem:[%s3236_s1 + $0x780] sm:$0xff] }
  0x69   :  { %1664 = vmatprep.subr.mxu0 %v275_v11  ;;  %1699 = vmatprep.subr.mxu1 %v307_v12  ;;  %v244_v10 = vld [vmem:[%s3236_s1 + $0x600] sm:$0xff]  ;;  %v41_v11 = vld [vmem:[%s3235_s0 + $0x68] sm:$0xff] }
  0x6a   :  { %851 = vmatmul.mubr.f32.vlgmr.msra.gmra.mxu1 %v38_v13  ;;  %1665 = vmatpush3.msra.mxu0 %v259_v14  ;;  %v276_v12 = vld [vmem:[%s3236_s1 + $0x700] sm:$0xff]  ;;  %v43_v14 = vld [vmem:[%s3235_s0 + $0x78] sm:$0xff] }
  0x6b   :  { %1700 = vmatpush3.msra.mxu1 %v291_v15  ;;  %1666 = vmatprep.subr.mxu0 %v274_v16  ;;  %v40_v13 = vld [vmem:[%s3235_s0 + $0x60] sm:$0xff]  ;;  %v339_v15 = vld [vmem:[%s3236_s1 + $0x8f8] sm:$0xff] }
  0x6c   :  { %1701 = vmatprep.subr.mxu1 %v306_v17  ;;  %1667 = vmatpush3.msra.mxu0 %v258_v18  ;;  %v371_v16 = vld [vmem:[%s3236_s1 + $0x9f8] sm:$0xff]  ;;  %v42_v17 = vld [vmem:[%s3235_s0 + $0x70] sm:$0xff] }
  0x6d   :  { %1702 = vmatpush3.msra.mxu1 %v290_v19  ;;  %1668 = vmatprep.subr.mxu0 %v273_v20  ;;  %v323_v18 = vld [vmem:[%s3236_s1 + $0x878] sm:$0xff]  ;;  %v338_v20 = vld [vmem:[%s3236_s1 + $0x8f0] sm:$0xff] }
  0x6e   :  { %1703 = vmatprep.subr.mxu1 %v305_v21  ;;  %1669 = vmatpush3.msra.mxu0 %v257_v22  ;;  %v355_v19 = vld [vmem:[%s3236_s1 + $0x978] sm:$0xff]  ;;  %v370_v21 = vld [vmem:[%s3236_s1 + $0x9f0] sm:$0xff] }
  0x6f   :  { %1704 = vmatpush3.msra.mxu1 %v289_v23  ;;  %1670 = vmatprep.subr.mxu0 %v272_v24 }
  0x70   :  { %1705 = vmatprep.subr.mxu1 %v304_v25  ;;  %1671 = vmatpush3.msra.mxu0 %v256_v26 }
  0x71   :  { %1706 = vmatpush3.msra.mxu1 %v288_v27  ;;  %1672 = vmatprep.subr.mxu0 %v271_v28 }
  0x72   :  { %1707 = vmatprep.subr.mxu1 %v303_v29  ;;  %1673 = vmatpush3.msra.mxu0 %v255_v30 }
  0x73   :  { %1708 = vmatpush3.msra.mxu1 %v287_v31  ;;  %1674 = vmatprep.subr.mxu0 %v270_v32 }
  0x74   :  { %1709 = vmatprep.subr.mxu1 %v302_v33  ;;  %1675 = vmatpush3.msra.mxu0 %v254_v34 }
  0x75   :  { %1710 = vmatpush3.msra.mxu1 %v286_v35  ;;  %1676 = vmatprep.subr.mxu0 %v269_v36 }
  0x76   :  { %1711 = vmatprep.subr.mxu1 %v301_v37  ;;  %1677 = vmatpush3.msra.mxu0 %v253_v38 }
  0x77   :  { %1712 = vmatpush3.msra.mxu1 %v285_v39  ;;  %1678 = vmatprep.subr.mxu0 %v268_v40 }
  0x78   :  { %1713 = vmatprep.subr.mxu1 %v300_v41  ;;  %1679 = vmatpush3.msra.mxu0 %v252_v42 }
  0x79   :  { %1714 = vmatpush3.msra.mxu1 %v284_v43  ;;  %1680 = vmatprep.subr.mxu0 %v267_v44 }
  0x7a   :  { %1715 = vmatprep.subr.mxu1 %v299_v45  ;;  %1681 = vmatpush3.msra.mxu0 %v251_v46 }
  0x7b   :  { %1716 = vmatpush3.msra.mxu1 %v283_v47  ;;  %1682 = vmatprep.subr.mxu0 %v266_v48 }
  0x7c   :  { %1717 = vmatprep.subr.mxu1 %v298_v49  ;;  %1683 = vmatpush3.msra.mxu0 %v250_v50 }
  0x7d   :  { %1718 = vmatpush3.msra.mxu1 %v282_v51  ;;  %1684 = vmatprep.subr.mxu0 %v265_v52 }
  0x7e   :  { %1719 = vmatprep.subr.mxu1 %v297_v53  ;;  %1685 = vmatpush3.msra.mxu0 %v249_v54 }
  0x7f   :  { %1720 = vmatpush3.msra.mxu1 %v281_v55  ;;  %1686 = vmatprep.subr.mxu0 %v264_v56 }
  0x80   :  { %1721 = vmatprep.subr.mxu1 %v296_v57  ;;  %1687 = vmatpush3.msra.mxu0 %v248_v58 }
  0x81   :  { %1722 = vmatpush3.msra.mxu1 %v280_v59  ;;  %1688 = vmatprep.subr.mxu0 %v263_v60 }
  0x82   :  { %1723 = vmatprep.subr.mxu1 %v295_v61  ;;  %1689 = vmatpush3.msra.mxu0 %v247_v62 }
  0x83   :  { %1724 = vmatpush3.msra.mxu1 %v279_v63  ;;  %1690 = vmatprep.subr.mxu0 %v262_v0 }
  0x84   :  { %1725 = vmatprep.subr.mxu1 %v294_v1  ;;  %1691 = vmatpush3.msra.mxu0 %v246_v2 }
  0x85   :  { %1726 = vmatpush3.msra.mxu1 %v278_v3  ;;  %1692 = vmatprep.subr.mxu0 %v261_v4 }
  0x86   :  { %1727 = vmatprep.subr.mxu1 %v293_v5  ;;  %1693 = vmatpush3.msra.mxu0 %v245_v6 }
  0x87   :  { %1728 = vmatpush3.msra.mxu1 %v277_v7  ;;  %1694 = vmatprep.subr.mxu0 %v260_v8 }
  0x88   :  { %1729 = vmatprep.subr.mxu1 %v292_v9  ;;  %1695 = vmatpush3.msra.mxu0 %v244_v10 }
  0x89   :  { %920 = vmatprep.mubr.f32.mxu0 %v41_v11  ;;  %1730 = vmatpush3.msra.mxu1 %v276_v12 }
  0x8a   :  { %921 = vmatmul.mubr.f32.vlgmr.msra.gmra.mxu0 %v40_v13  ;;  %990 = vmatprep.mubr.f32.mxu1 %v43_v14 }
  0x8b   :  { %1734 = vmatprep.subr.mxu0 %v339_v15 }
  0x8c   :  { %10 = vsyncpa [#allocation4], 0  ;;  %1769 = vmatprep.subr.mxu1 %v371_v16  ;;  %991 = vmatmul.mubr.f32.vlgmr.msra.gmra.mxu1 %v42_v17  ;;  %v322_v22 = vld [vmem:[%s3236_s1 + $0x870] sm:$0xff]  ;;  %v337_v24 = vld [vmem:[%s3236_s1 + $0x8e8] sm:$0xff]  ;;  %vm25_vm0 = vcmask 523264   ;;  %vm1932_vm1 = vmmov 0  }
  0x8d   :  { %v354_v23 = vld [vmem:[%s3236_s1 + $0x970] sm:$0xff]  ;;  %1735 = vmatpush3.msra.mxu0 %v323_v18  ;;  %1770 = vmatpush3.msra.mxu1 %v355_v19  ;;  %v369_v25 = vld [vmem:[%s3236_s1 + $0x9e8] sm:$0xff]  ;;  %v336_v28 = vld [vmem:[%s3236_s1 + $0x8e0] sm:$0xff]  ;;  %vm1399_vm2 = vcmask 261120   ;;  %s1933_s29 = smov [#allocation3]  }
  0x8e   :  { %1736 = vmatprep.subr.mxu0 %v338_v20  ;;  %1771 = vmatprep.subr.mxu1 %v370_v21  ;;  %v321_v26 = vld [vmem:[%s3236_s1 + $0x868] sm:$0xff]  ;;  %v368_v29 = vld [vmem:[%s3236_s1 + $0x9e0] sm:$0xff]  ;;  %v335_v32 = vld [vmem:[%s3236_s1 + $0x8d8] sm:$0xff]  ;;  %s1441_s30 = sshll.u32 %s1933_s29, 4  ;;  %s1442_s30 = int_to_ptr.vmem [resolvable:$true] %s1441_s30 }
  0x8f   :  { %v353_v27 = vld [vmem:[%s3236_s1 + $0x968] sm:$0xff]  ;;  %1737 = vmatpush3.msra.mxu0 %v322_v22  ;;  %1772 = vmatpush3.msra.mxu1 %v354_v23  ;;  %v320_v30 = vld [vmem:[%s3236_s1 + $0x860] sm:$0xff]  ;;  %v367_v33 = vld [vmem:[%s3236_s1 + $0x9d8] sm:$0xff]  ;;  %s1909_s6 = scalar_lea.vmem %s1442_s30, 128  ;;  %p1914_p1 = scmp.lt.s32.totalorder %s1442_s30, %s1442_s30 }
  0x90   :  { %1738 = vmatprep.subr.mxu0 %v337_v24  ;;  %1773 = vmatprep.subr.mxu1 %v369_v25  ;;  %v352_v31 = vld [vmem:[%s3236_s1 + $0x960] sm:$0xff]  ;;  %v319_v34 = vld [vmem:[%s3236_s1 + $0x858] sm:$0xff]  ;;  %v334_v36 = vld [vmem:[%s3236_s1 + $0x8d0] sm:$0xff]  ;;  %p1910_p0 = scmp.ne.s32.totalorder %s1442_s30, %s1909_s6  ;;  %p1915_p2 = scmp.lt.s32.totalorder %s1909_s6, %s1909_s6 }
  0x91   :  { %1739 = vmatpush3.msra.mxu0 %v321_v26  ;;  %1774 = vmatpush3.msra.mxu1 %v353_v27  ;;  %v351_v35 = vld [vmem:[%s3236_s1 + $0x958] sm:$0xff]  ;;  %v366_v37 = vld [vmem:[%s3236_s1 + $0x9d0] sm:$0xff]  ;;  %v333_v40 = vld [vmem:[%s3236_s1 + $0x8c8] sm:$0xff] }
  0x92   :  { %1740 = vmatprep.subr.mxu0 %v336_v28  ;;  %1775 = vmatprep.subr.mxu1 %v368_v29  ;;  %v318_v38 = vld [vmem:[%s3236_s1 + $0x850] sm:$0xff]  ;;  %v365_v41 = vld [vmem:[%s3236_s1 + $0x9c8] sm:$0xff]  ;;  %v332_v44 = vld [vmem:[%s3236_s1 + $0x8c0] sm:$0xff]  ;;  %p1916_p3 = por %p1915_p2, %p1914_p1 }
  0x93   :  { %1741 = vmatpush3.msra.mxu0 %v320_v30  ;;  %1776 = vmatpush3.msra.mxu1 %v352_v31  ;;  %v350_v39 = vld [vmem:[%s3236_s1 + $0x950] sm:$0xff]  ;;  %v317_v42 = vld [vmem:[%s3236_s1 + $0x848] sm:$0xff]  ;;  %v364_v45 = vld [vmem:[%s3236_s1 + $0x9c0] sm:$0xff] }
  0x94   :  { %1742 = vmatprep.subr.mxu0 %v335_v32  ;;  %1777 = vmatprep.subr.mxu1 %v367_v33  ;;  %v349_v43 = vld [vmem:[%s3236_s1 + $0x948] sm:$0xff]  ;;  %v316_v46 = vld [vmem:[%s3236_s1 + $0x840] sm:$0xff]  ;;  %v331_v48 = vld [vmem:[%s3236_s1 + $0x8b8] sm:$0xff]  ;;  %p1917_p4 = pnand %p1916_p3, %p1910_p0 }
  0x95   :  { %1743 = vmatpush3.msra.mxu0 %v319_v34  ;;  %1778 = vmatpush3.msra.mxu1 %v351_v35  ;;  %v348_v47 = vld [vmem:[%s3236_s1 + $0x940] sm:$0xff]  ;;  %v363_v49 = vld [vmem:[%s3236_s1 + $0x9b8] sm:$0xff]  ;;  %v330_v52 = vld [vmem:[%s3236_s1 + $0x8b0] sm:$0xff] }
  0x96   :  { %1744 = vmatprep.subr.mxu0 %v334_v36  ;;  %1779 = vmatprep.subr.mxu1 %v366_v37  ;;  %v315_v50 = vld [vmem:[%s3236_s1 + $0x838] sm:$0xff]  ;;  %v362_v53 = vld [vmem:[%s3236_s1 + $0x9b0] sm:$0xff]  ;;  %v329_v56 = vld [vmem:[%s3236_s1 + $0x8a8] sm:$0xff] }
  0x97   :  { %1745 = vmatpush3.msra.mxu0 %v318_v38  ;;  %1780 = vmatpush3.msra.mxu1 %v350_v39  ;;  %v347_v51 = vld [vmem:[%s3236_s1 + $0x938] sm:$0xff]  ;;  %v314_v54 = vld [vmem:[%s3236_s1 + $0x830] sm:$0xff]  ;;  %v361_v57 = vld [vmem:[%s3236_s1 + $0x9a8] sm:$0xff] }
  0x98   :  { %1746 = vmatprep.subr.mxu0 %v333_v40  ;;  %1781 = vmatprep.subr.mxu1 %v365_v41  ;;  %v346_v55 = vld [vmem:[%s3236_s1 + $0x930] sm:$0xff]  ;;  %v313_v58 = vld [vmem:[%s3236_s1 + $0x828] sm:$0xff]  ;;  %v328_v60 = vld [vmem:[%s3236_s1 + $0x8a0] sm:$0xff] }
  0x99   :  { %1747 = vmatpush3.msra.mxu0 %v317_v42  ;;  %1782 = vmatpush3.msra.mxu1 %v349_v43  ;;  %v345_v59 = vld [vmem:[%s3236_s1 + $0x928] sm:$0xff]  ;;  %v360_v61 = vld [vmem:[%s3236_s1 + $0x9a0] sm:$0xff]  ;;  %v327_v0 = vld [vmem:[%s3236_s1 + $0x898] sm:$0xff] }
  0x9a   :  { %1748 = vmatprep.subr.mxu0 %v332_v44  ;;  %1783 = vmatprep.subr.mxu1 %v364_v45  ;;  %v312_v62 = vld [vmem:[%s3236_s1 + $0x820] sm:$0xff]  ;;  %v359_v1 = vld [vmem:[%s3236_s1 + $0x998] sm:$0xff]  ;;  %v326_v4 = vld [vmem:[%s3236_s1 + $0x890] sm:$0xff] }
  0x9b   :  { %1749 = vmatpush3.msra.mxu0 %v316_v46  ;;  %1784 = vmatpush3.msra.mxu1 %v348_v47  ;;  %v344_v63 = vld [vmem:[%s3236_s1 + $0x920] sm:$0xff]  ;;  %v311_v2 = vld [vmem:[%s3236_s1 + $0x818] sm:$0xff]  ;;  %v358_v5 = vld [vmem:[%s3236_s1 + $0x990] sm:$0xff] }
  0x9c   :  { %1750 = vmatprep.subr.mxu0 %v331_v48  ;;  %1785 = vmatprep.subr.mxu1 %v363_v49  ;;  %v343_v3 = vld [vmem:[%s3236_s1 + $0x918] sm:$0xff]  ;;  %v310_v6 = vld [vmem:[%s3236_s1 + $0x810] sm:$0xff]  ;;  %v325_v8 = vld [vmem:[%s3236_s1 + $0x888] sm:$0xff] }
  0x9d   :  { %1751 = vmatpush3.msra.mxu0 %v315_v50  ;;  %1786 = vmatpush3.msra.mxu1 %v347_v51  ;;  %v342_v7 = vld [vmem:[%s3236_s1 + $0x910] sm:$0xff]  ;;  %v357_v9 = vld [vmem:[%s3236_s1 + $0x988] sm:$0xff]  ;;  %v324_v12 = vld [vmem:[%s3236_s1 + $0x880] sm:$0xff] }
  0x9e   :  { %1752 = vmatprep.subr.mxu0 %v330_v52  ;;  %1787 = vmatprep.subr.mxu1 %v362_v53  ;;  %v309_v10 = vld [vmem:[%s3236_s1 + $0x808] sm:$0xff]  ;;  %v356_v13 = vld [vmem:[%s3236_s1 + $0x980] sm:$0xff]  ;;  %v47_v18 = vld [vmem:[%s3235_s0 + $0x98] sm:$0xff] }
  0x9f   :  { %1753 = vmatpush3.msra.mxu0 %v314_v54  ;;  %1788 = vmatpush3.msra.mxu1 %v346_v55  ;;  %v341_v11 = vld [vmem:[%s3236_s1 + $0x908] sm:$0xff]  ;;  %v308_v14 = vld [vmem:[%s3236_s1 + $0x800] sm:$0xff]  ;;  %v403_v19 = vld [vmem:[%s3236_s1 + $0xaf8] sm:$0xff] }
  0xa0   :  { %1754 = vmatprep.subr.mxu0 %v329_v56  ;;  %1789 = vmatprep.subr.mxu1 %v361_v57  ;;  %v45_v15 = vld [vmem:[%s3235_s0 + $0x88] sm:$0xff]  ;;  %v340_v16 = vld [vmem:[%s3236_s1 + $0x900] sm:$0xff]  ;;  %v435_v20 = vld [vmem:[%s3236_s1 + $0xbf8] sm:$0xff] }
  0xa1   :  { %1755 = vmatpush3.msra.mxu0 %v313_v58  ;;  %1790 = vmatpush3.msra.mxu1 %v345_v59  ;;  %v44_v17 = vld [vmem:[%s3235_s0 + $0x80] sm:$0xff]  ;;  %v46_v21 = vld [vmem:[%s3235_s0 + $0x90] sm:$0xff]  ;;  %v387_v22 = vld [vmem:[%s3236_s1 + $0xa78] sm:$0xff] }
  0xa2   :  { %1756 = vmatprep.subr.mxu0 %v328_v60  ;;  %1791 = vmatprep.subr.mxu1 %v360_v61  ;;  %v419_v23 = vld [vmem:[%s3236_s1 + $0xb78] sm:$0xff]  ;;  %v402_v24 = vld [vmem:[%s3236_s1 + $0xaf0] sm:$0xff]  ;;  %v401_v28 = vld [vmem:[%s3236_s1 + $0xae8] sm:$0xff] }
  0xa3   :  { %1757 = vmatpush3.msra.mxu0 %v312_v62  ;;  %1792 = vmatpush3.msra.mxu1 %v344_v63  ;;  %v434_v25 = vld [vmem:[%s3236_s1 + $0xbf0] sm:$0xff]  ;;  %v433_v29 = vld [vmem:[%s3236_s1 + $0xbe8] sm:$0xff]  ;;  %v400_v32 = vld [vmem:[%s3236_s1 + $0xae0] sm:$0xff] }
  0xa4   :  { %1758 = vmatprep.subr.mxu0 %v327_v0  ;;  %1793 = vmatprep.subr.mxu1 %v359_v1  ;;  %v386_v26 = vld [vmem:[%s3236_s1 + $0xa70] sm:$0xff]  ;;  %v385_v30 = vld [vmem:[%s3236_s1 + $0xa68] sm:$0xff]  ;;  %v432_v33 = vld [vmem:[%s3236_s1 + $0xbe0] sm:$0xff] }
  0xa5   :  { %1759 = vmatpush3.msra.mxu0 %v311_v2  ;;  %1794 = vmatpush3.msra.mxu1 %v343_v3  ;;  %v418_v27 = vld [vmem:[%s3236_s1 + $0xb70] sm:$0xff]  ;;  %v417_v31 = vld [vmem:[%s3236_s1 + $0xb68] sm:$0xff]  ;;  %v384_v34 = vld [vmem:[%s3236_s1 + $0xa60] sm:$0xff] }
  0xa6   :  { %1760 = vmatprep.subr.mxu0 %v326_v4  ;;  %1795 = vmatprep.subr.mxu1 %v358_v5  ;;  %v416_v35 = vld [vmem:[%s3236_s1 + $0xb60] sm:$0xff]  ;;  %v399_v36 = vld [vmem:[%s3236_s1 + $0xad8] sm:$0xff]  ;;  %v398_v40 = vld [vmem:[%s3236_s1 + $0xad0] sm:$0xff] }
  0xa7   :  { %1761 = vmatpush3.msra.mxu0 %v310_v6  ;;  %1796 = vmatpush3.msra.mxu1 %v342_v7  ;;  %v431_v37 = vld [vmem:[%s3236_s1 + $0xbd8] sm:$0xff]  ;;  %v430_v41 = vld [vmem:[%s3236_s1 + $0xbd0] sm:$0xff]  ;;  %v397_v44 = vld [vmem:[%s3236_s1 + $0xac8] sm:$0xff] }
  0xa8   :  { %1762 = vmatprep.subr.mxu0 %v325_v8  ;;  %1797 = vmatprep.subr.mxu1 %v357_v9  ;;  %v383_v38 = vld [vmem:[%s3236_s1 + $0xa58] sm:$0xff]  ;;  %v382_v42 = vld [vmem:[%s3236_s1 + $0xa50] sm:$0xff]  ;;  %v429_v45 = vld [vmem:[%s3236_s1 + $0xbc8] sm:$0xff] }
  0xa9   :  { %1763 = vmatpush3.msra.mxu0 %v309_v10  ;;  %1798 = vmatpush3.msra.mxu1 %v341_v11  ;;  %v415_v39 = vld [vmem:[%s3236_s1 + $0xb58] sm:$0xff]  ;;  %v414_v43 = vld [vmem:[%s3236_s1 + $0xb50] sm:$0xff]  ;;  %v381_v46 = vld [vmem:[%s3236_s1 + $0xa48] sm:$0xff] }
  0xaa   :  { %1764 = vmatprep.subr.mxu0 %v324_v12  ;;  %1799 = vmatprep.subr.mxu1 %v356_v13  ;;  %v413_v47 = vld [vmem:[%s3236_s1 + $0xb48] sm:$0xff]  ;;  %v396_v48 = vld [vmem:[%s3236_s1 + $0xac0] sm:$0xff]  ;;  %v395_v52 = vld [vmem:[%s3236_s1 + $0xab8] sm:$0xff] }
  0xab   :  { %1765 = vmatpush3.msra.mxu0 %v308_v14  ;;  %1060 = vmatprep.mubr.f32.mxu0 %v45_v15  ;;  %v428_v49 = vld [vmem:[%s3236_s1 + $0xbc0] sm:$0xff]  ;;  %v427_v53 = vld [vmem:[%s3236_s1 + $0xbb8] sm:$0xff]  ;;  %v394_v56 = vld [vmem:[%s3236_s1 + $0xab0] sm:$0xff] }
  0xac   :  { %1800 = vmatpush3.msra.mxu1 %v340_v16  ;;  %1061 = vmatmul.mubr.f32.vlgmr.msra.gmra.mxu0 %v44_v17  ;;  %v380_v50 = vld [vmem:[%s3236_s1 + $0xa40] sm:$0xff]  ;;  %v379_v54 = vld [vmem:[%s3236_s1 + $0xa38] sm:$0xff]  ;;  %v426_v57 = vld [vmem:[%s3236_s1 + $0xbb0] sm:$0xff] }
  0xad   :  { %1130 = vmatprep.mubr.f32.mxu1 %v47_v18  ;;  %1804 = vmatprep.subr.mxu0 %v403_v19  ;;  %v412_v51 = vld [vmem:[%s3236_s1 + $0xb40] sm:$0xff]  ;;  %v411_v55 = vld [vmem:[%s3236_s1 + $0xb38] sm:$0xff]  ;;  %v378_v58 = vld [vmem:[%s3236_s1 + $0xa30] sm:$0xff] }
  0xae   :  { %1839 = vmatprep.subr.mxu1 %v435_v20  ;;  %1131 = vmatmul.mubr.f32.vlgmr.msra.gmra.mxu1 %v46_v21  ;;  %v410_v59 = vld [vmem:[%s3236_s1 + $0xb30] sm:$0xff]  ;;  %v393_v60 = vld [vmem:[%s3236_s1 + $0xaa8] sm:$0xff]  ;;  %v392_v0 = vld [vmem:[%s3236_s1 + $0xaa0] sm:$0xff] }
  0xaf   :  { %1805 = vmatpush3.msra.mxu0 %v387_v22  ;;  %1840 = vmatpush3.msra.mxu1 %v419_v23  ;;  %v425_v61 = vld [vmem:[%s3236_s1 + $0xba8] sm:$0xff]  ;;  %v424_v1 = vld [vmem:[%s3236_s1 + $0xba0] sm:$0xff]  ;;  %v391_v4 = vld [vmem:[%s3236_s1 + $0xa98] sm:$0xff] }
  0xb0   :  { %1806 = vmatprep.subr.mxu0 %v402_v24  ;;  %1841 = vmatprep.subr.mxu1 %v434_v25  ;;  %v377_v62 = vld [vmem:[%s3236_s1 + $0xa28] sm:$0xff]  ;;  %v376_v2 = vld [vmem:[%s3236_s1 + $0xa20] sm:$0xff]  ;;  %v423_v5 = vld [vmem:[%s3236_s1 + $0xb98] sm:$0xff]  ;;  %v1931_v24 = vmov 0.0  }
  0xb1   :  { %1807 = vmatpush3.msra.mxu0 %v386_v26  ;;  %1842 = vmatpush3.msra.mxu1 %v418_v27  ;;  %v409_v63 = vld [vmem:[%s3236_s1 + $0xb28] sm:$0xff]  ;;  %v408_v3 = vld [vmem:[%s3236_s1 + $0xb20] sm:$0xff]  ;;  %v375_v6 = vld [vmem:[%s3236_s1 + $0xa18] sm:$0xff]  ;;  %26 = vst.msk [vmem:[#allocation2] sm:$0xff] %vm25_vm0, %v1931_v24 }
  0xb2   :  { %1808 = vmatprep.subr.mxu0 %v401_v28  ;;  %1843 = vmatprep.subr.mxu1 %v433_v29  ;;  %v407_v7 = vld [vmem:[%s3236_s1 + $0xb18] sm:$0xff]  ;;  %v390_v8 = vld [vmem:[%s3236_s1 + $0xa90] sm:$0xff]  ;;  %v389_v12 = vld [vmem:[%s3236_s1 + $0xa88] sm:$0xff] }
  0xb3   :  { %1809 = vmatpush3.msra.mxu0 %v385_v30  ;;  %1844 = vmatpush3.msra.mxu1 %v417_v31  ;;  %v422_v9 = vld [vmem:[%s3236_s1 + $0xb90] sm:$0xff]  ;;  %v421_v13 = vld [vmem:[%s3236_s1 + $0xb88] sm:$0xff]  ;;  %v388_v16 = vld [vmem:[%s3236_s1 + $0xa80] sm:$0xff] }
  0xb4   :  { %1810 = vmatprep.subr.mxu0 %v400_v32  ;;  %1845 = vmatprep.subr.mxu1 %v432_v33  ;;  %v374_v10 = vld [vmem:[%s3236_s1 + $0xa10] sm:$0xff]  ;;  %v373_v14 = vld [vmem:[%s3236_s1 + $0xa08] sm:$0xff]  ;;  %v420_v17 = vld [vmem:[%s3236_s1 + $0xb80] sm:$0xff] }
  0xb5   :  { %1811 = vmatpush3.msra.mxu0 %v384_v34  ;;  %1846 = vmatpush3.msra.mxu1 %v416_v35  ;;  %v406_v11 = vld [vmem:[%s3236_s1 + $0xb10] sm:$0xff]  ;;  %v405_v15 = vld [vmem:[%s3236_s1 + $0xb08] sm:$0xff]  ;;  %v372_v18 = vld [vmem:[%s3236_s1 + $0xa00] sm:$0xff] }
  0xb6   :  { %1812 = vmatprep.subr.mxu0 %v399_v36  ;;  %1847 = vmatprep.subr.mxu1 %v431_v37  ;;  %v49_v19 = vld [vmem:[%s3235_s0 + $0xa8] sm:$0xff]  ;;  %v404_v20 = vld [vmem:[%s3236_s1 + $0xb00] sm:$0xff]  ;;  %v51_v21 = vld [vmem:[%s3235_s0 + $0xb8] sm:$0xff] }
  0xb7   :  { %1813 = vmatpush3.msra.mxu0 %v383_v38  ;;  %1848 = vmatpush3.msra.mxu1 %v415_v39  ;;  %v48_v22 = vld [vmem:[%s3235_s0 + $0xa0] sm:$0xff]  ;;  %v50_v23 = vld [vmem:[%s3235_s0 + $0xb0] sm:$0xff]  ;;  %v1325_v25 = vld [vmem:[%s3238_s3 + $0x38] sm:$0xff] }
  0xb8   :  { %1814 = vmatprep.subr.mxu0 %v398_v40  ;;  %1849 = vmatprep.subr.mxu1 %v430_v41  ;;  %v1324_v26 = vld [vmem:[%s3238_s3 + $0x30] sm:$0xff]  ;;  %v1323_v27 = vld [vmem:[%s3238_s3 + $0x28] sm:$0xff]  ;;  %v1322_v28 = vld [vmem:[%s3238_s3 + $0x20] sm:$0xff] }
  0xb9   :  { %1815 = vmatpush3.msra.mxu0 %v382_v42  ;;  %1850 = vmatpush3.msra.mxu1 %v414_v43  ;;  %v1321_v29 = vld [vmem:[%s3238_s3 + $0x18] sm:$0xff]  ;;  %v1320_v30 = vld [vmem:[%s3238_s3 + $0x10] sm:$0xff]  ;;  %v1319_v31 = vld [vmem:[%s3238_s3 + $0x8] sm:$0xff] }
  0xba   :  { %1816 = vmatprep.subr.mxu0 %v397_v44  ;;  %1851 = vmatprep.subr.mxu1 %v429_v45  ;;  %v1318_v32 = vld [vmem:[%s3238_s3] sm:$0xff] }
  0xbb   :  { %1817 = vmatpush3.msra.mxu0 %v381_v46  ;;  %1852 = vmatpush3.msra.mxu1 %v413_v47 }
  0xbc   :  { %1818 = vmatprep.subr.mxu0 %v396_v48  ;;  %1853 = vmatprep.subr.mxu1 %v428_v49 }
  0xbd   :  { %1819 = vmatpush3.msra.mxu0 %v380_v50  ;;  %1854 = vmatpush3.msra.mxu1 %v412_v51 }
  0xbe   :  { %1820 = vmatprep.subr.mxu0 %v395_v52  ;;  %1855 = vmatprep.subr.mxu1 %v427_v53 }
  0xbf   :  { %1821 = vmatpush3.msra.mxu0 %v379_v54  ;;  %1856 = vmatpush3.msra.mxu1 %v411_v55 }
  0xc0   :  { %1822 = vmatprep.subr.mxu0 %v394_v56  ;;  %1857 = vmatprep.subr.mxu1 %v426_v57 }
  0xc1   :  { %1823 = vmatpush3.msra.mxu0 %v378_v58  ;;  %1858 = vmatpush3.msra.mxu1 %v410_v59 }
  0xc2   :  { %1824 = vmatprep.subr.mxu0 %v393_v60  ;;  %1859 = vmatprep.subr.mxu1 %v425_v61 }
  0xc3   :  { %1825 = vmatpush3.msra.mxu0 %v377_v62  ;;  %1860 = vmatpush3.msra.mxu1 %v409_v63 }
  0xc4   :  { %1826 = vmatprep.subr.mxu0 %v392_v0  ;;  %1861 = vmatprep.subr.mxu1 %v424_v1 }
  0xc5   :  { %1827 = vmatpush3.msra.mxu0 %v376_v2  ;;  %1862 = vmatpush3.msra.mxu1 %v408_v3 }
  0xc6   :  { %1828 = vmatprep.subr.mxu0 %v391_v4  ;;  %1863 = vmatprep.subr.mxu1 %v423_v5 }
  0xc7   :  { %1829 = vmatpush3.msra.mxu0 %v375_v6  ;;  %1864 = vmatpush3.msra.mxu1 %v407_v7 }
  0xc8   :  { %1830 = vmatprep.subr.mxu0 %v390_v8  ;;  %1865 = vmatprep.subr.mxu1 %v422_v9 }
  0xc9   :  { %1831 = vmatpush3.msra.mxu0 %v374_v10  ;;  %1866 = vmatpush3.msra.mxu1 %v406_v11 }
  0xca   :  { %1832 = vmatprep.subr.mxu0 %v389_v12  ;;  %1867 = vmatprep.subr.mxu1 %v421_v13 }
  0xcb   :  { %1833 = vmatpush3.msra.mxu0 %v373_v14  ;;  %1868 = vmatpush3.msra.mxu1 %v405_v15  ;;  %v27_v15 = vld [vmem:[#allocation2] sm:$0xff] }
  0xcc   :  { %1834 = vmatprep.subr.mxu0 %v388_v16  ;;  %1869 = vmatprep.subr.mxu1 %v420_v17 }
  0xcd   :  { %1835 = vmatpush3.msra.mxu0 %v372_v18  ;;  %1200 = vmatprep.mubr.f32.mxu0 %v49_v19 }
  0xce   :  { %1870 = vmatpush3.msra.mxu1 %v404_v20  ;;  %1270 = vmatprep.mubr.f32.mxu1 %v51_v21 }
  0xcf   :  { %1201 = vmatmul.mubr.f32.vlgmr.msra.gmra.mxu0 %v48_v22  ;;  %1271 = vmatmul.mubr.f32.vlgmr.msra.gmra.mxu1 %v50_v23 }
  0xd0   :  { %1883 = vmatprep.subr.mxu0 %v1931_v24  ;;  %1899 = vmatprep.mubr.msk.f32.mxu0 %vm1932_vm1, %v1931_v24 }
  0xd1   :  { %1884 = vmatpush3.msra.mxu0 %v1325_v25 }
  0xd2   :  { %1885 = vmatprep.subr.mxu0 %v1931_v24 }
  0xd3   :  { %1886 = vmatpush3.msra.mxu0 %v1324_v26 }
  0xd4   :  { %1887 = vmatprep.subr.mxu0 %v1931_v24 }
  0xd5   :  { %1888 = vmatpush3.msra.mxu0 %v1323_v27 }
  0xd6   :  { %1889 = vmatprep.subr.mxu0 %v1931_v24 }
  0xd7   :  { %1890 = vmatpush3.msra.mxu0 %v1322_v28 }
  0xd8   :  { %1891 = vmatprep.subr.mxu0 %v1931_v24 }
  0xd9   :  { %1892 = vmatpush3.msra.mxu0 %v1321_v29 }
  0xda   :  { %1893 = vmatprep.subr.mxu0 %v1931_v24 }
  0xdb   :  { %1894 = vmatpush3.msra.mxu0 %v1320_v30 }
  0xdc   :  { %1895 = vmatprep.subr.mxu0 %v1931_v24 }
  0xdd   :  { %1896 = vmatpush3.msra.mxu0 %v1319_v31 }
  0xde   :  { %1897 = vmatprep.subr.mxu0 %v1931_v24 }
  0xdf   :  { %1898 = vmatpush3.msra.mxu0 %v1318_v32 }
  0xe4   :  { %v1486_v33 = vpop.f32.mrf.mxu0 }
  0xe5   :  { %v1521_v34 = vpop.f32.mrf.mxu1 }
  0xe6   :  { %v1487_v35 = vpop.f32.mrf.mxu0 }
  0xe7   :  { %v1522_v37 = vpop.f32.mrf.mxu1  ;;  %v1488_v40 = vadd.f32 %v1487_v35, %v1486_v33 }
  0xe8   :  { %v1523_v41 = vadd.f32 %v1522_v37, %v1521_v34 }
  0xea   :  { %v573_v45 = vadd.f32 %v1523_v41, %v1488_v40  ;;  %v1450_v41 = vld [vmem:[%s3237_s2 + $0x1] ss:$0 sm:$0xff] }
 0x106   :  { %v1556_v36 = vpop.f32.mrf.mxu0 }
 0x108   :  { %v1591_v38 = vpop.f32.mrf.mxu1  ;;  %v1557_v39 = vpop.f32.mrf.mxu0 }
 0x109   :  { %v1558_v43 = vadd.f32 %v1557_v39, %v1556_v36  ;;  %v1449_v39 = vld [vmem:[%s3237_s2] ss:$0 sm:$0xff] }
 0x10a   :  { %v1592_v44 = vpop.f32.mrf.mxu1 }
 0x10b   :  { %v643_v48 = vadd.f32 %v1558_v43, %v573_v45  ;;  %v1593_v49 = vadd.f32 %v1592_v44, %v1591_v38 }
 0x10d   :  { %v713_v53 = vadd.f32 %v1593_v49, %v643_v48 }
 0x128   :  { %v1626_v42 = vpop.f32.mrf.mxu0 }
 0x12a   :  { %v1661_v46 = vpop.f32.mrf.mxu1  ;;  %v1627_v47 = vpop.f32.mrf.mxu0 }
 0x12b   :  { %v1628_v51 = vadd.f32 %v1627_v47, %v1626_v42 }
 0x12c   :  { %v1662_v52 = vpop.f32.mrf.mxu1 }
 0x12d   :  { %v783_v56 = vadd.f32 %v1628_v51, %v713_v53  ;;  %v1663_v57 = vadd.f32 %v1662_v52, %v1661_v46 }
 0x12f   :  { %v853_v61 = vadd.f32 %v1663_v57, %v783_v56 }
 0x14a   :  { %v1696_v50 = vpop.f32.mrf.mxu0 }
 0x14c   :  { %v1731_v54 = vpop.f32.mrf.mxu1  ;;  %v1697_v55 = vpop.f32.mrf.mxu0 }
 0x14d   :  { %v1698_v59 = vadd.f32 %v1697_v55, %v1696_v50 }
 0x14e   :  { %v1732_v60 = vpop.f32.mrf.mxu1 }
 0x14f   :  { %v923_v0 = vadd.f32 %v1698_v59, %v853_v61  ;;  %v1733_v1 = vadd.f32 %v1732_v60, %v1731_v54 }
 0x151   :  { %v993_v4 = vadd.f32 %v1733_v1, %v923_v0 }
 0x16c   :  { %v1766_v58 = vpop.f32.mrf.mxu0 }
 0x16e   :  { %v1801_v62 = vpop.f32.mrf.mxu1  ;;  %v1767_v63 = vpop.f32.mrf.mxu0 }
 0x16f   :  { %v1768_v2 = vadd.f32 %v1767_v63, %v1766_v58 }
 0x170   :  { %v1802_v3 = vpop.f32.mrf.mxu1 }
 0x171   :  { %v1063_v5 = vadd.f32 %v1768_v2, %v993_v4  ;;  %v1803_v6 = vadd.f32 %v1802_v3, %v1801_v62  ;;  %v1452_v3 = vld [vmem:[%s3239_s4] ss:$0 sm:$0xff] }
 0x173   :  { %v1133_v11 = vadd.f32 %v1803_v6, %v1063_v5  ;;  %v1453_v5 = vld [vmem:[%s3239_s4 + $0x1] ss:$0 sm:$0xff] }
 0x18f   :  { %v1836_v7 = vpop.f32.mrf.mxu0  ;;  %v1871_v8 = vpop.f32.mrf.mxu1 }
 0x191   :  { %v1837_v9 = vpop.f32.mrf.mxu0  ;;  %v1872_v10 = vpop.f32.mrf.mxu1 }
 0x192   :  { %v1838_v12 = vadd.f32 %v1837_v9, %v1836_v7  ;;  %v1873_v14 = vadd.f32 %v1872_v10, %v1871_v8 }
 0x194   :  { %v1203_v13 = vadd.f32 %v1838_v12, %v1133_v11 }
 0x196   :  { %v1273_v16 = vadd.f32 %v1873_v14, %v1203_v13 }
 0x198   :  { %v1276_v17 = vadd.f32 %v1273_v16, %v27_v15 }
 0x19a   :  { %1278 = vst.msk [vmem:[#allocation2] sm:$0xff] %vm25_vm0, %v1276_v17 }
 0x1a1   :  { %v1282_v18 = vld [vmem:[#allocation2] sm:$0xff] }
 0x1a2   :  { %v1283_v19 = vsel %vm25_vm0, %v1282_v18, 0.0 }
 0x1a3   :  { %v1284_v20 = vrot.slane %v1283_v19, 4 }
 0x1a5   :  { %v1285_v21 = vadd.f32 %v1284_v20, %v1283_v19 }
 0x1a7   :  { %v1286_v22 = vrot.slane %v1285_v21, 2 }
 0x1a9   :  { %v1287_v23 = vadd.f32 %v1286_v22, %v1285_v21 }
 0x1ab   :  { %v1288_v24 = vrot.slane %v1287_v23, 1 }
 0x1ad   :  { %v1289_v25 = vadd.f32 %v1288_v24, %v1287_v23 }
 0x1af   :  { %v1291_v26 = vmul.f32 0.125, %v1289_v25 }
 0x1b1   :  { %v1292_v27 = vsub.f32 %v1282_v18, %v1291_v26 }
 0x1b3   :  { %v1293_v28 = vmul.f32 %v1292_v27, %v1292_v27 }
 0x1b5   :  { %v1294_v29 = vsel %vm25_vm0, %v1293_v28, 0.0 }
 0x1b6   :  { %v1295_v30 = vrot.slane %v1294_v29, 4 }
 0x1b8   :  { %v1296_v31 = vadd.f32 %v1295_v30, %v1294_v29 }
 0x1ba   :  { %v1297_v32 = vrot.slane %v1296_v31, 2 }
 0x1bc   :  { %v1298_v33 = vadd.f32 %v1297_v32, %v1296_v31 }
 0x1be   :  { %v1299_v34 = vrot.slane %v1298_v33, 1 }
 0x1c0   :  { %v1300_v35 = vadd.f32 %v1299_v34, %v1298_v33 }
 0x1c2   :  { %v1301_v36 = vmul.f32 0.125, %v1300_v35 }
 0x1c4   :  { %v1302_v37 = vadd.f32 1e-05, %v1301_v36 }
 0x1c6   :  { %1905 = vrsqrt.f32 %v1302_v37 }
 0x1d3   :  { %v1906_v38 = vpop.eup %1905 }
 0x1d4   :  { %v1304_v40 = vmul.f32 %v1906_v38, %v1292_v27 }
 0x1d6   :  { %v1310_v42 = vmul.f32 %v1449_v39, %v1304_v40 }
 0x1d8   :  { %v1316_v43 = vadd.f32 %v1450_v41, %v1310_v42 }
 0x1da   :  { %v1317_v44 = vmax.f32 %v1316_v43, 0.0 }
 0x1dc   :  { %1900 = vmatmul.mubr.msk.f32.vlgmr.msra.gmra.mxu0 %vm25_vm0, %v1317_v44 }
 0x29c   :  { %v1395_v45 = vpop.f32.mrf.mxu0 }
 0x29d   :  { %v1400_v46 = vsel %vm1399_vm2, %v1395_v45, 0.0 }
 0x29e   :  { %v1401_v47 = vrot.slane %v1400_v46, 4  ;;  %v1901_v48 = vpop.f32.mrf.mxu0 }
 0x2a0   :  { %v1402_v49 = vadd.f32 %v1401_v47, %v1400_v46 }
 0x2a2   :  { %v1403_v50 = vrot.slane %v1402_v49, 2 }
 0x2a4   :  { %v1404_v51 = vadd.f32 %v1403_v50, %v1402_v49 }
 0x2a6   :  { %v1405_v52 = vrot.slane %v1404_v51, 1 }
 0x2a8   :  { %v1406_v53 = vadd.f32 %v1405_v52, %v1404_v51 }
 0x2aa   :  { %v1407_v54 = vmul.f32 0.125, %v1406_v53 }
 0x2ac   :  { %v1408_v55 = vsub.f32 %v1395_v45, %v1407_v54 }
 0x2ae   :  { %v1409_v56 = vmul.f32 %v1408_v55, %v1408_v55 }
 0x2b0   :  { %v1410_v57 = vsel %vm1399_vm2, %v1409_v56, 0.0 }
 0x2b1   :  { %v1411_v58 = vrot.slane %v1410_v57, 4 }
 0x2b3   :  { %v1412_v59 = vadd.f32 %v1411_v58, %v1410_v57 }
 0x2b5   :  { %v1413_v60 = vrot.slane %v1412_v59, 2 }
 0x2b7   :  { %v1414_v61 = vadd.f32 %v1413_v60, %v1412_v59 }
 0x2b9   :  { %v1415_v62 = vrot.slane %v1414_v61, 1 }
 0x2bb   :  { %v1416_v63 = vadd.f32 %v1415_v62, %v1414_v61 }
 0x2bd   :  { %v1417_v0 = vmul.f32 0.125, %v1416_v63 }
 0x2bf   :  { %v1418_v1 = vadd.f32 1e-05, %v1417_v0 }
 0x2c1   :  { %1907 = vrsqrt.f32 %v1418_v1 }
 0x2ce   :  { %v1908_v2 = vpop.eup %1907 }
 0x2cf   :  { %v1420_v4 = vmul.f32 %v1908_v2, %v1408_v55 }
 0x2d1   :  { %v1426_v6 = vmul.f32 %v1452_v3, %v1420_v4 }
 0x2d3   :  { %v1432_v7 = vadd.f32 %v1453_v5, %v1426_v6 }
 0x2d5   :  { %v1433_v8 = vmax.f32 %v1432_v7, 0.0 }
 0x2d7   :  { %1434 = vst.msk [vmem:[#allocation3] sm:$0xff] %vm1399_vm2, %v1433_v8 }
 0x2d8   :  { %1920 = shalt.err (!%p1917_p4)
}
 0x2d9   :  { %1444 = dma.vmem_to_hbm [thread:$0]  %s1442_s30, 128, %s3240_s5, [#allocation4]  }
 0x2da   :  { %1929 = dma.done.wait [#allocation4], 128  }
 0x2db   :  { %1930 = vsyncadd [#allocation4], 4294967168 }
 0x2dc   :  { %1448 = vsyncpa [#allocation4], 1 }

</bundles_post_ra>
